<compile_context>
chip_gen: v6e
topology: v6e:2x2x1
jax: 0.10.0
libtpu: 0.0.40
codegen_flags: <defaults>
</compile_context>

<pallas_src>
import math
import functools

import jax
import jax.numpy as jnp
from jax.experimental import pallas as pl
from jax.experimental.pallas import tpu as pltpu

LN_EPS = 1e-5          # LAYER_NROM_EPS in the reference
FLASH_SEQ_THRESHOLD = 1024   # above this, use the online-softmax KV-tiled path


# ----------------------------------------------------------------------------
# Numeric helpers
# ----------------------------------------------------------------------------
def _layernorm(x, eps=LN_EPS):
    mu = jnp.mean(x, axis=-1, keepdims=True)
    var = jnp.mean(jnp.square(x - mu), axis=-1, keepdims=True)
    return (x - mu) * jax.lax.rsqrt(var + eps)


def _gelu_tanh(x):
    # tanh-approx GELU: transcendental goes to the EUP slot instead of a
    # ~12-op VALU erf polynomial on the widest (S, F) tensor in the kernel.
    c = math.sqrt(2.0 / math.pi)
    return 0.5 * x * (1.0 + jnp.tanh(c * (x + 0.044715 * x * x * x)))


def _gelu_exact(x):
    # exact erf GELU (pure-JAX reference only; matches torch.nn.GELU()).
    return 0.5 * x * (1.0 + jax.scipy.special.erf(x / math.sqrt(2.0)))


# ----------------------------------------------------------------------------
# Pallas kernel
# ----------------------------------------------------------------------------
def block_kernel(x_ref, ss_ref,
                 wq_ref, wk_ref, wv_ref, wo_ref,
                 bpk_ref,                      # (8, E): b_q,b_k,b_v,b_out,g2,bt2,b2,pad
                 w1_ref, b1_ref, w2_ref,
                 o_ref, *, n_head, kv_tile):
    bf16 = jnp.bfloat16
    f32 = jnp.float32
    x = x_ref[...]                             # (S, E) fp32
    S, E = x.shape
    H = n_head
    D = E // H

    scale = ss_ref[0:1, :]
    shift = ss_ref[1:2, :]
    b_q = bpk_ref[0:1, :]
    b_k = bpk_ref[1:2, :]
    b_v = bpk_ref[2:3, :]
    b_o = bpk_ref[3:4, :]
    g2 = bpk_ref[4:5, :]
    bt2 = bpk_ref[5:6, :]
    b2 = bpk_ref[6:7, :]

    # ---- AdaLayerNorm (scale/shift projected from the timestep emb in the wrapper)
    h = _layernorm(x) * (1.0 + scale) + shift                        # (S, E) f32
    hb = h.astype(bf16)

    # ---- Multi-head self-attention (nn.MultiheadAttention, eval mode)
    q = jnp.dot(hb, wq_ref[...], preferred_element_type=f32) + b_q   # (S, E)
    k = jnp.dot(hb, wk_ref[...], preferred_element_type=f32) + b_k
    v = jnp.dot(hb, wv_ref[...], preferred_element_type=f32) + b_v

    # TODO(synk): a per-head (H,E,D) weight layout would emit q/k/v already
    # head-major, but the required 2-D x 3-D no-batch dot_general is not
    # supported by the Mosaic lowering; keep the reshape/transpose (XLU) path.
    qh = q.reshape(S, H, D).transpose(1, 0, 2).astype(bf16)          # (H, S, D)
    kh = k.reshape(S, H, D).transpose(1, 0, 2).astype(bf16)
    vh = v.reshape(S, H, D).transpose(1, 0, 2).astype(bf16)

    sm_scale = 1.0 / math.sqrt(D)

    if kv_tile >= S:
        # Direct path (small / moderate S): materialize (H, S, S) once.
        s = jnp.einsum('hqd,hkd->hqk', qh, kh,
                       preferred_element_type=f32) * sm_scale        # (H, S, S)
        s = s - jnp.max(s, axis=-1, keepdims=True)
        p = jnp.exp(s)
        p = p * pl.reciprocal(jnp.sum(p, axis=-1, keepdims=True), approx=True)
        ah = jnp.einsum('hqk,hkd->hqd', p.astype(bf16), vh,
                        preferred_element_type=f32)                  # (H, S, D)
    else:
        # Flash-style online softmax over KV tiles: scores are (H, S, kv_tile),
        # never (H, S, S).  Static unroll keeps every slice static (no
        # dynamic-slice lowering risk).
        # TODO(synk): for very long S, switch to a fori_loop with VMEM scratch
        # accumulators (m/l/acc) to bound live ranges and code size.
        n_kv = S // kv_tile
        m = jnp.full((H, S, 1), -jnp.inf, f32)
        l = jnp.zeros((H, S, 1), f32)
        acc = jnp.zeros((H, S, D), f32)
        for t in range(n_kv):
            k_t = kh[:, t * kv_tile:(t + 1) * kv_tile, :]
            v_t = vh[:, t * kv_tile:(t + 1) * kv_tile, :]
            s = jnp.einsum('hqd,hkd->hqk', qh, k_t,
                           preferred_element_type=f32) * sm_scale    # (H, S, T)
            m_new = jnp.maximum(m, jnp.max(s, axis=-1, keepdims=True))
            alpha = jnp.exp(m - m_new)
            p = jnp.exp(s - m_new)
            l = alpha * l + jnp.sum(p, axis=-1, keepdims=True)
            acc = alpha * acc + jnp.einsum('hqk,hkd->hqd', p.astype(bf16), v_t,
                                           preferred_element_type=f32)
            m = m_new
        ah = acc * pl.reciprocal(l, approx=True)                     # (H, S, D)

    attn = ah.transpose(1, 0, 2).reshape(S, E)                       # (S, E)
    attn = jnp.dot(attn.astype(bf16), wo_ref[...],
                   preferred_element_type=f32) + b_o
    x = x + attn                                                     # residual 1

    # ---- LayerNorm (affine) + MLP (Linear -> GELU -> Linear, dropout=identity)
    y = _layernorm(x) * g2 + bt2
    y = jnp.dot(y.astype(bf16), w1_ref[...],
                preferred_element_type=f32) + b1_ref[...]            # (S, F)
    # TODO(synk): on v6e/v7x, do this bias-add + GELU in bf16 to halve the (S,F)
    # footprint; keep fp32 on v5e (no bf16 VPU/EUP).
    y = _gelu_tanh(y)
    y = jnp.dot(y.astype(bf16), w2_ref[...],
                preferred_element_type=f32) + b2                     # (S, E)
    o_ref[...] = x + y                                               # residual 2


# ----------------------------------------------------------------------------
# Helpers: timestep embedding, params, one-time weight prep
# ----------------------------------------------------------------------------
def sinusoidal_pos_emb(t, dim, num_steps, rescale_steps=4000.0):
    # NOTE: SinusoidalPosEmb's source is not shown in the reference; this is the
    # standard sin/cos embedding (VQ-Diffusion style) with timestep rescaling.
    x = t.astype(jnp.float32) / float(num_steps) * rescale_steps
    half = dim // 2
    freq = jnp.exp(jnp.arange(half, dtype=jnp.float32)
                   * (-math.log(10000.0) / (half - 1)))
    ang = x[:, None] * freq[None, :]
    return jnp.concatenate([jnp.sin(ang), jnp.cos(ang)], axis=-1)    # (B, dim)


def make_params(key, n_embd, n_head, dim_feedforward):
    E, F = n_embd, dim_feedforward
    ks = jax.random.split(key, 10)
    std = 0.02
    return {
        # AdaLayerNorm's Linear(n_embd, 2*n_embd): stored transposed for x @ W
        "w_ada": jax.random.normal(ks[0], (E, 2 * E), jnp.float32) * std,
        "b_ada": jax.random.normal(ks[1], (1, 2 * E), jnp.float32) * std,
        # nn.MultiheadAttention in-projection, pre-split into q/k/v
        "w_q": jax.random.normal(ks[2], (E, E), jnp.float32) * std,
        "w_k": jax.random.normal(ks[3], (E, E), jnp.float32) * std,
        "w_v": jax.random.normal(ks[4], (E, E), jnp.float32) * std,
        "b_q": jnp.zeros((1, E), jnp.float32),
        "b_k": jnp.zeros((1, E), jnp.float32),
        "b_v": jnp.zeros((1, E), jnp.float32),
        # attention out-projection
        "w_out": jax.random.normal(ks[5], (E, E), jnp.float32) * std,
        "b_out": jnp.zeros((1, E), jnp.float32),
        # ln2 affine
        "g2": jnp.ones((1, E), jnp.float32),
        "bt2": jnp.zeros((1, E), jnp.float32),
        # MLP
        "w1": jax.random.normal(ks[6], (E, F), jnp.float32) * std,
        "b1": jax.random.normal(ks[7], (1, F), jnp.float32) * std,
        "w2": jax.random.normal(ks[8], (F, E), jnp.float32) * std,
        "b2": jax.random.normal(ks[9], (1, E), jnp.float32) * std,
    }


def prepare_kernel_weights(params):
    """One-time prep: bf16 MXU weights + packed (8,E) bias/affine slab.
    Do this once per model (not per forward) so no per-call cast traffic."""
    bf = jnp.bfloat16
    E = params["w_q"].shape[0]
    bpack = jnp.concatenate(
        [params["b_q"], params["b_k"], params["b_v"], params["b_out"],
         params["g2"], params["bt2"], params["b2"],
         jnp.zeros((1, E), jnp.float32)],                # pad to 8 sublanes
        axis=0)                                          # (8, E) fp32
    return {
        "w_q": params["w_q"].astype(bf),
        "w_k": params["w_k"].astype(bf),
        "w_v": params["w_v"].astype(bf),
        "w_out": params["w_out"].astype(bf),
        "w1": params["w1"].astype(bf),
        "w2": params["w2"].astype(bf),
        "b1": params["b1"],                              # fp32 bias
        "bpack": bpack,
    }


def _pick_kv_tile(S, cap=512):
    # largest divisor of S that is <= cap, preferring multiples of 128
    for t in range(min(cap, S), 127, -1):
        if S % t == 0 and t % 128 == 0:
            return t
    for t in range(min(cap, S), 0, -1):
        if S % t == 0:
            return t
    return S


def _default_vmem_limit(frac=0.8):
    # Generation-aware cap: ~80% of physical VMEM (≈51 MiB v7x, ≈102 MiB v5e/v6e).
    try:
        cap = int(pltpu.get_tpu_info().vmem_capacity_bytes)
    except Exception:
        cap = 64 << 20     # conservative fallback (v7x per-core)
    return int(max(32 << 20, min(int(cap * frac), 110 << 20)))


# ----------------------------------------------------------------------------
# Wrapper: hoisted AdaLN projection + pallas_call
# ----------------------------------------------------------------------------
def transformer_block(x, timestep, params, *, n_head, num_timesteps,
                      kernel_weights=None):
    B, S, E = x.shape
    assert E % n_head == 0, "n_embd must be divisible by n_head"
    if kernel_weights is None:
        kernel_weights = prepare_kernel_weights(params)
    kw = kernel_weights
    F = kw["w1"].shape[1]

    # ---- hoisted AdaLayerNorm projection (degenerate M=1 matmul stays in XLA)
    emb = sinusoidal_pos_emb(timestep, E, num_timesteps)              # (B, E)
    e = emb * jax.nn.sigmoid(emb)                                     # SiLU
    ss = (e @ params["w_ada"] + params["b_ada"]).reshape(B, 2, E)     # row0=scale, row1=shift

    kv_tile = S if S <= FLASH_SEQ_THRESHOLD else _pick_kv_tile(S)
    kernel = functools.partial(block_kernel, n_head=n_head, kv_tile=kv_tile)
    vmem_limit = _default_vmem_limit()

    # TODO(synk): add a query-tile grid axis (parallel) so v7x's second
    # TensorCore is used at B==1; needs full-seq K/V visible per q-tile.
    def run(single_buffer_weights):
        def wspec(shape):
            idx = lambda *_: (0,) * len(shape)
            if single_buffer_weights:
                # grid-invariant weights: nothing to overlap -> single buffer
                return pl.BlockSpec(shape, idx, pipeline_mode=pl.Buffered(1))
            return pl.BlockSpec(shape, idx)

        return pl.pallas_call(
            kernel,
            out_shape=jax.ShapeDtypeStruct((B, S, E), jnp.float32),
            grid_spec=pltpu.PrefetchScalarGridSpec(
                num_scalar_prefetch=0,
                grid=(B,),
                in_specs=[
                    pl.BlockSpec((None, S, E), lambda b: (b, 0, 0)),  # x -> (S, E)
                    pl.BlockSpec((None, 2, E), lambda b: (b, 0, 0)),  # scale/shift pack
                    wspec((E, E)), wspec((E, E)), wspec((E, E)),      # w_q, w_k, w_v
                    wspec((E, E)),                                    # w_out
                    wspec((8, E)),                                    # packed biases/gamma/beta
                    wspec((E, F)), wspec((1, F)), wspec((F, E)),      # mlp w1, b1, w2
                ],
                out_specs=pl.BlockSpec((None, S, E), lambda b: (b, 0, 0)),
            ),
            compiler_params=pltpu.CompilerParams(
                dimension_semantics=("parallel",),
                vmem_limit_bytes=vmem_limit),
        )(x, ss, kw["w_q"], kw["w_k"], kw["w_v"], kw["w_out"],
          kw["bpack"], kw["w1"], kw["b1"], kw["w2"])

    try:
        return run(True)
    except Exception:
        # jax without BlockSpec.pipeline_mode / pl.Buffered support:
        # fall back to default double-buffered weight specs (known-good config).
        return run(False)


# ----------------------------------------------------------------------------
# Pure-JAX fp32 reference for the correctness check
# ----------------------------------------------------------------------------
def reference_block(x, timestep, params, *, n_head, num_timesteps):
    B, S, E = x.shape
    D = E // n_head
    emb = sinusoidal_pos_emb(timestep, E, num_timesteps)
    e = emb * jax.nn.sigmoid(emb)
    ss = e @ params["w_ada"] + params["b_ada"]
    scale, shift = ss[:, None, :E], ss[:, None, E:]
    h = _layernorm(x) * (1.0 + scale) + shift
    q = h @ params["w_q"] + params["b_q"]
    k = h @ params["w_k"] + params["b_k"]
    v = h @ params["w_v"] + params["b_v"]
    q = q.reshape(B, S, n_head, D).transpose(0, 2, 1, 3)
    k = k.reshape(B, S, n_head, D).transpose(0, 2, 1, 3)
    v = v.reshape(B, S, n_head, D).transpose(0, 2, 1, 3)
    s = jnp.einsum("bhqd,bhkd->bhqk", q, k) / math.sqrt(D)
    p = jax.nn.softmax(s, axis=-1)
    a = jnp.einsum("bhqk,bhkd->bhqd", p, v).transpose(0, 2, 1, 3).reshape(B, S, E)
    x = x + (a @ params["w_out"] + params["b_out"])
    y = _layernorm(x) * params["g2"] + params["bt2"]
    y = _gelu_exact(y @ params["w1"] + params["b1"]) @ params["w2"] + params["b2"]
    return x + y


if __name__ == "__main__":
    B, S, E, H, F = 2, 8, 32, 4, 64
    NUM_TIMESTEPS = 1000

    key = jax.random.PRNGKey(0)
    kx, kp = jax.random.split(key)
    x = jax.random.normal(kx, (B, S, E), jnp.float32)
    timestep = jnp.array([10, 500], dtype=jnp.int32)
    params = make_params(kp, E, H, F)
    kernel_weights = prepare_kernel_weights(params)     # one-time bf16 prep

    out = transformer_block(x, timestep, params, n_head=H,
                            num_timesteps=NUM_TIMESTEPS,
                            kernel_weights=kernel_weights)
    out = jax.block_until_ready(out)

    ref = reference_block(x, timestep, params, n_head=H, num_timesteps=NUM_TIMESTEPS)
    assert out.shape == (B, S, E)
    err = float(jnp.max(jnp.abs(out - ref)))
    assert jnp.allclose(out, ref, atol=2e-3, rtol=2e-3), err

    print("KERNEL_OK")
</pallas_src>

<mosaic_0001>
module attributes {stable_mosaic.version = 11 : i64} {
  func.func @block_kernel(%arg0: i32, %arg1: memref<1x8x32xf32, #tpu.memory_space<vmem>>, %arg2: memref<1x2x32xf32, #tpu.memory_space<vmem>>, %arg3: memref<32x32xbf16, #tpu.memory_space<vmem>>, %arg4: memref<32x32xbf16, #tpu.memory_space<vmem>>, %arg5: memref<32x32xbf16, #tpu.memory_space<vmem>>, %arg6: memref<32x32xbf16, #tpu.memory_space<vmem>>, %arg7: memref<8x32xf32, #tpu.memory_space<vmem>>, %arg8: memref<32x64xbf16, #tpu.memory_space<vmem>>, %arg9: memref<1x64xf32, #tpu.memory_space<vmem>>, %arg10: memref<64x32xbf16, #tpu.memory_space<vmem>>, %arg11: memref<1x8x32xf32, #tpu.memory_space<vmem>>) attributes {dimension_semantics = [#tpu.dimension_semantics<parallel>], iteration_bounds = array<i64: 2>, scalar_prefetch = 0 : i64, scratch_operands = 0 : i64, tpu.core_type = #tpu.core_type<tc>, window_params = [{transform_indices = @transform_0, window_bounds = array<i64: 1, 8, 32>}, {transform_indices = @transform_1, window_bounds = array<i64: 1, 2, 32>}, {pipeline_mode = #tpu.pipeline_mode<synchronous>, transform_indices = @transform_2, window_bounds = array<i64: 32, 32>}, {pipeline_mode = #tpu.pipeline_mode<synchronous>, transform_indices = @transform_3, window_bounds = array<i64: 32, 32>}, {pipeline_mode = #tpu.pipeline_mode<synchronous>, transform_indices = @transform_4, window_bounds = array<i64: 32, 32>}, {pipeline_mode = #tpu.pipeline_mode<synchronous>, transform_indices = @transform_5, window_bounds = array<i64: 32, 32>}, {pipeline_mode = #tpu.pipeline_mode<synchronous>, transform_indices = @transform_6, window_bounds = array<i64: 8, 32>}, {pipeline_mode = #tpu.pipeline_mode<synchronous>, transform_indices = @transform_7, window_bounds = array<i64: 32, 64>}, {pipeline_mode = #tpu.pipeline_mode<synchronous>, transform_indices = @transform_8, window_bounds = array<i64: 1, 64>}, {pipeline_mode = #tpu.pipeline_mode<synchronous>, transform_indices = @transform_9, window_bounds = array<i64: 64, 32>}, {transform_indices = @transform_10, window_bounds = array<i64: 1, 8, 32>}]} {
    %c0 = arith.constant 0 : index
    %c0_0 = arith.constant 0 : index
    %c0_1 = arith.constant 0 : index
    %0 = vector.load %arg1[%c0, %c0_0, %c0_1] : memref<1x8x32xf32, #tpu.memory_space<vmem>>, vector<1x8x32xf32>
    %1 = vector.shape_cast %0 : vector<1x8x32xf32> to vector<8x32xf32>
    %c0_2 = arith.constant 0 : index
    %c0_3 = arith.constant 0 : index
    %c0_4 = arith.constant 0 : index
    %2 = vector.load %arg2[%c0_2, %c0_3, %c0_4] : memref<1x2x32xf32, #tpu.memory_space<vmem>>, vector<1x1x32xf32>
    %3 = vector.shape_cast %2 : vector<1x1x32xf32> to vector<1x32xf32>
    %c0_5 = arith.constant 0 : index
    %c1 = arith.constant 1 : index
    %c0_6 = arith.constant 0 : index
    %4 = vector.load %arg2[%c0_5, %c1, %c0_6] : memref<1x2x32xf32, #tpu.memory_space<vmem>>, vector<1x1x32xf32>
    %5 = vector.shape_cast %4 : vector<1x1x32xf32> to vector<1x32xf32>
    %c0_7 = arith.constant 0 : index
    %c0_8 = arith.constant 0 : index
    %6 = vector.load %arg7[%c0_7, %c0_8] : memref<8x32xf32, #tpu.memory_space<vmem>>, vector<1x32xf32>
    %c1_9 = arith.constant 1 : index
    %c0_10 = arith.constant 0 : index
    %7 = vector.load %arg7[%c1_9, %c0_10] : memref<8x32xf32, #tpu.memory_space<vmem>>, vector<1x32xf32>
    %c2 = arith.constant 2 : index
    %c0_11 = arith.constant 0 : index
    %8 = vector.load %arg7[%c2, %c0_11] : memref<8x32xf32, #tpu.memory_space<vmem>>, vector<1x32xf32>
    %c3 = arith.constant 3 : index
    %c0_12 = arith.constant 0 : index
    %9 = vector.load %arg7[%c3, %c0_12] : memref<8x32xf32, #tpu.memory_space<vmem>>, vector<1x32xf32>
    %c4 = arith.constant 4 : index
    %c0_13 = arith.constant 0 : index
    %10 = vector.load %arg7[%c4, %c0_13] : memref<8x32xf32, #tpu.memory_space<vmem>>, vector<1x32xf32>
    %c5 = arith.constant 5 : index
    %c0_14 = arith.constant 0 : index
    %11 = vector.load %arg7[%c5, %c0_14] : memref<8x32xf32, #tpu.memory_space<vmem>>, vector<1x32xf32>
    %c6 = arith.constant 6 : index
    %c0_15 = arith.constant 0 : index
    %12 = vector.load %arg7[%c6, %c0_15] : memref<8x32xf32, #tpu.memory_space<vmem>>, vector<1x32xf32>
    %cst = arith.constant dense<0.000000e+00> : vector<8xf32>
    %13 = vector.multi_reduction <add>, %1, %cst [1] : vector<8x32xf32> to vector<8xf32>
    %14 = vector.shape_cast %13 : vector<8xf32> to vector<8x1xf32>
    %cst_16 = arith.constant 3.200000e+01 : f32
    %15 = vector.broadcast %cst_16 : f32 to vector<8x1xf32>
    %16 = arith.divf %14, %15 : vector<8x1xf32>
    %17 = vector.broadcast %16 : vector<8x1xf32> to vector<8x32xf32>
    %18 = arith.subf %1, %17 : vector<8x32xf32>
    %19 = arith.mulf %18, %18 : vector<8x32xf32>
    %cst_17 = arith.constant dense<0.000000e+00> : vector<8xf32>
    %20 = vector.multi_reduction <add>, %19, %cst_17 [1] : vector<8x32xf32> to vector<8xf32>
    %21 = vector.shape_cast %20 : vector<8xf32> to vector<8x1xf32>
    %cst_18 = arith.constant 3.200000e+01 : f32
    %22 = vector.broadcast %cst_18 : f32 to vector<8x1xf32>
    %23 = arith.divf %21, %22 : vector<8x1xf32>
    %24 = vector.broadcast %16 : vector<8x1xf32> to vector<8x32xf32>
    %25 = arith.subf %1, %24 : vector<8x32xf32>
    %cst_19 = arith.constant 9.99999974E-6 : f32
    %26 = vector.broadcast %cst_19 : f32 to vector<8x1xf32>
    %27 = arith.addf %23, %26 : vector<8x1xf32>
    %28 = math.rsqrt %27 : vector<8x1xf32>
    %29 = vector.broadcast %28 : vector<8x1xf32> to vector<8x32xf32>
    %30 = arith.mulf %25, %29 : vector<8x32xf32>
    %cst_20 = arith.constant 1.000000e+00 : f32
    %31 = vector.broadcast %cst_20 : f32 to vector<1x32xf32>
    %32 = arith.addf %31, %3 : vector<1x32xf32>
    %33 = vector.broadcast %32 : vector<1x32xf32> to vector<8x32xf32>
    %34 = arith.mulf %30, %33 : vector<8x32xf32>
    %35 = vector.broadcast %5 : vector<1x32xf32> to vector<8x32xf32>
    %36 = arith.addf %34, %35 : vector<8x32xf32>
    %37 = arith.truncf %36 : vector<8x32xf32> to vector<8x32xbf16>
    %c0_21 = arith.constant 0 : index
    %c0_22 = arith.constant 0 : index
    %38 = vector.load %arg3[%c0_21, %c0_22] : memref<32x32xbf16, #tpu.memory_space<vmem>>, vector<32x32xbf16>
    %cst_23 = arith.constant dense<0.000000e+00> : vector<8x32xf32>
    %39 = tpu.matmul %37, %38, %cst_23 {dimension_numbers = #tpu.dot_dimension_numbers<[1], [0], [0], [1], [0, 0, 1, 1], [], []>} : vector<8x32xbf16>, vector<32x32xbf16>, vector<8x32xf32> -> vector<8x32xf32>
    %40 = vector.broadcast %6 : vector<1x32xf32> to vector<8x32xf32>
    %41 = arith.addf %39, %40 : vector<8x32xf32>
    %c0_24 = arith.constant 0 : index
    %c0_25 = arith.constant 0 : index
    %42 = vector.load %arg4[%c0_24, %c0_25] : memref<32x32xbf16, #tpu.memory_space<vmem>>, vector<32x32xbf16>
    %cst_26 = arith.constant dense<0.000000e+00> : vector<8x32xf32>
    %43 = tpu.matmul %37, %42, %cst_26 {dimension_numbers = #tpu.dot_dimension_numbers<[1], [0], [0], [1], [0, 0, 1, 1], [], []>} : vector<8x32xbf16>, vector<32x32xbf16>, vector<8x32xf32> -> vector<8x32xf32>
    %44 = vector.broadcast %7 : vector<1x32xf32> to vector<8x32xf32>
    %45 = arith.addf %43, %44 : vector<8x32xf32>
    %c0_27 = arith.constant 0 : index
    %c0_28 = arith.constant 0 : index
    %46 = vector.load %arg5[%c0_27, %c0_28] : memref<32x32xbf16, #tpu.memory_space<vmem>>, vector<32x32xbf16>
    %cst_29 = arith.constant dense<0.000000e+00> : vector<8x32xf32>
    %47 = tpu.matmul %37, %46, %cst_29 {dimension_numbers = #tpu.dot_dimension_numbers<[1], [0], [0], [1], [0, 0, 1, 1], [], []>} : vector<8x32xbf16>, vector<32x32xbf16>, vector<8x32xf32> -> vector<8x32xf32>
    %48 = vector.broadcast %8 : vector<1x32xf32> to vector<8x32xf32>
    %49 = arith.addf %47, %48 : vector<8x32xf32>
    %50 = vector.shape_cast %41 : vector<8x32xf32> to vector<8x4x8xf32>
    %51 = tpu.transpose %50, [1, 0, 2] : vector<8x4x8xf32> -> vector<4x8x8xf32>
    %52 = arith.truncf %51 : vector<4x8x8xf32> to vector<4x8x8xbf16>
    %53 = vector.shape_cast %45 : vector<8x32xf32> to vector<8x4x8xf32>
    %54 = tpu.transpose %53, [1, 0, 2] : vector<8x4x8xf32> -> vector<4x8x8xf32>
    %55 = arith.truncf %54 : vector<4x8x8xf32> to vector<4x8x8xbf16>
    %56 = vector.shape_cast %49 : vector<8x32xf32> to vector<8x4x8xf32>
    %57 = tpu.transpose %56, [1, 0, 2] : vector<8x4x8xf32> -> vector<4x8x8xf32>
    %58 = arith.truncf %57 : vector<4x8x8xf32> to vector<4x8x8xbf16>
    "tpu.trace_start"() <{level = 10 : i32, message = "hqd,hkd->hqk"}> : () -> ()
    %cst_30 = arith.constant dense<0.000000e+00> : vector<4x8x8xf32>
    %59 = tpu.matmul %52, %55, %cst_30 {dimension_numbers = #tpu.dot_dimension_numbers<[2], [2], [1], [1], [0, 0, 0, 1, 1, 1], [0], [0]>} : vector<4x8x8xbf16>, vector<4x8x8xbf16>, vector<4x8x8xf32> -> vector<4x8x8xf32>
    "tpu.trace_stop"() : () -> ()
    %cst_31 = arith.constant 0.353553385 : f32
    %60 = vector.broadcast %cst_31 : f32 to vector<4x8x8xf32>
    %61 = arith.mulf %59, %60 : vector<4x8x8xf32>
    %cst_32 = arith.constant dense<0xFF800000> : vector<4x8xf32>
    %62 = vector.multi_reduction <maximumf>, %61, %cst_32 [2] : vector<4x8x8xf32> to vector<4x8xf32>
    %63 = vector.shape_cast %62 : vector<4x8xf32> to vector<4x8x1xf32>
    %64 = vector.broadcast %63 : vector<4x8x1xf32> to vector<4x8x8xf32>
    %65 = arith.subf %61, %64 : vector<4x8x8xf32>
    %66 = math.exp %65 : vector<4x8x8xf32>
    %cst_33 = arith.constant dense<0.000000e+00> : vector<4x8xf32>
    %67 = vector.multi_reduction <add>, %66, %cst_33 [2] : vector<4x8x8xf32> to vector<4x8xf32>
    %68 = vector.shape_cast %67 : vector<4x8xf32> to vector<4x8x1xf32>
    %69 = tpu.reciprocal %68 {approx = true} : vector<4x8x1xf32> -> vector<4x8x1xf32>
    %70 = vector.broadcast %69 : vector<4x8x1xf32> to vector<4x8x8xf32>
    %71 = arith.mulf %66, %70 : vector<4x8x8xf32>
    %72 = arith.truncf %71 : vector<4x8x8xf32> to vector<4x8x8xbf16>
    "tpu.trace_start"() <{level = 10 : i32, message = "hqk,hkd->hqd"}> : () -> ()
    %cst_34 = arith.constant dense<0.000000e+00> : vector<4x8x8xf32>
    %73 = tpu.matmul %72, %58, %cst_34 {dimension_numbers = #tpu.dot_dimension_numbers<[2], [1], [1], [2], [0, 0, 0, 1, 1, 2], [0], [0]>} : vector<4x8x8xbf16>, vector<4x8x8xbf16>, vector<4x8x8xf32> -> vector<4x8x8xf32>
    "tpu.trace_stop"() : () -> ()
    %74 = tpu.transpose %73, [1, 0, 2] : vector<4x8x8xf32> -> vector<8x4x8xf32>
    %75 = vector.shape_cast %74 : vector<8x4x8xf32> to vector<8x32xf32>
    %76 = arith.truncf %75 : vector<8x32xf32> to vector<8x32xbf16>
    %c0_35 = arith.constant 0 : index
    %c0_36 = arith.constant 0 : index
    %77 = vector.load %arg6[%c0_35, %c0_36] : memref<32x32xbf16, #tpu.memory_space<vmem>>, vector<32x32xbf16>
    %cst_37 = arith.constant dense<0.000000e+00> : vector<8x32xf32>
    %78 = tpu.matmul %76, %77, %cst_37 {dimension_numbers = #tpu.dot_dimension_numbers<[1], [0], [0], [1], [0, 0, 1, 1], [], []>} : vector<8x32xbf16>, vector<32x32xbf16>, vector<8x32xf32> -> vector<8x32xf32>
    %79 = vector.broadcast %9 : vector<1x32xf32> to vector<8x32xf32>
    %80 = arith.addf %78, %79 : vector<8x32xf32>
    %81 = arith.addf %1, %80 : vector<8x32xf32>
    %cst_38 = arith.constant dense<0.000000e+00> : vector<8xf32>
    %82 = vector.multi_reduction <add>, %81, %cst_38 [1] : vector<8x32xf32> to vector<8xf32>
    %83 = vector.shape_cast %82 : vector<8xf32> to vector<8x1xf32>
    %cst_39 = arith.constant 3.200000e+01 : f32
    %84 = vector.broadcast %cst_39 : f32 to vector<8x1xf32>
    %85 = arith.divf %83, %84 : vector<8x1xf32>
    %86 = vector.broadcast %85 : vector<8x1xf32> to vector<8x32xf32>
    %87 = arith.subf %81, %86 : vector<8x32xf32>
    %88 = arith.mulf %87, %87 : vector<8x32xf32>
    %cst_40 = arith.constant dense<0.000000e+00> : vector<8xf32>
    %89 = vector.multi_reduction <add>, %88, %cst_40 [1] : vector<8x32xf32> to vector<8xf32>
    %90 = vector.shape_cast %89 : vector<8xf32> to vector<8x1xf32>
    %cst_41 = arith.constant 3.200000e+01 : f32
    %91 = vector.broadcast %cst_41 : f32 to vector<8x1xf32>
    %92 = arith.divf %90, %91 : vector<8x1xf32>
    %93 = vector.broadcast %85 : vector<8x1xf32> to vector<8x32xf32>
    %94 = arith.subf %81, %93 : vector<8x32xf32>
    %cst_42 = arith.constant 9.99999974E-6 : f32
    %95 = vector.broadcast %cst_42 : f32 to vector<8x1xf32>
    %96 = arith.addf %92, %95 : vector<8x1xf32>
    %97 = math.rsqrt %96 : vector<8x1xf32>
    %98 = vector.broadcast %97 : vector<8x1xf32> to vector<8x32xf32>
    %99 = arith.mulf %94, %98 : vector<8x32xf32>
    %100 = vector.broadcast %10 : vector<1x32xf32> to vector<8x32xf32>
    %101 = arith.mulf %99, %100 : vector<8x32xf32>
    %102 = vector.broadcast %11 : vector<1x32xf32> to vector<8x32xf32>
    %103 = arith.addf %101, %102 : vector<8x32xf32>
    %104 = arith.truncf %103 : vector<8x32xf32> to vector<8x32xbf16>
    %c0_43 = arith.constant 0 : index
    %c0_44 = arith.constant 0 : index
    %105 = vector.load %arg8[%c0_43, %c0_44] : memref<32x64xbf16, #tpu.memory_space<vmem>>, vector<32x64xbf16>
    %cst_45 = arith.constant dense<0.000000e+00> : vector<8x64xf32>
    %106 = tpu.matmul %104, %105, %cst_45 {dimension_numbers = #tpu.dot_dimension_numbers<[1], [0], [0], [1], [0, 0, 1, 1], [], []>} : vector<8x32xbf16>, vector<32x64xbf16>, vector<8x64xf32> -> vector<8x64xf32>
    %c0_46 = arith.constant 0 : index
    %c0_47 = arith.constant 0 : index
    %107 = vector.load %arg9[%c0_46, %c0_47] : memref<1x64xf32, #tpu.memory_space<vmem>>, vector<1x64xf32>
    %108 = vector.broadcast %107 : vector<1x64xf32> to vector<8x64xf32>
    %109 = arith.addf %106, %108 : vector<8x64xf32>
    %cst_48 = arith.constant 5.000000e-01 : f32
    %110 = vector.broadcast %cst_48 : f32 to vector<8x64xf32>
    %111 = arith.mulf %110, %109 : vector<8x64xf32>
    %cst_49 = arith.constant 4.471500e-02 : f32
    %112 = vector.broadcast %cst_49 : f32 to vector<8x64xf32>
    %113 = arith.mulf %112, %109 : vector<8x64xf32>
    %114 = arith.mulf %113, %109 : vector<8x64xf32>
    %115 = arith.mulf %114, %109 : vector<8x64xf32>
    %116 = arith.addf %109, %115 : vector<8x64xf32>
    %cst_50 = arith.constant 0.797884583 : f32
    %117 = vector.broadcast %cst_50 : f32 to vector<8x64xf32>
    %118 = arith.mulf %117, %116 : vector<8x64xf32>
    %119 = math.tanh %118 : vector<8x64xf32>
    %cst_51 = arith.constant 1.000000e+00 : f32
    %120 = vector.broadcast %cst_51 : f32 to vector<8x64xf32>
    %121 = arith.addf %120, %119 : vector<8x64xf32>
    %122 = arith.mulf %111, %121 : vector<8x64xf32>
    %123 = arith.truncf %122 : vector<8x64xf32> to vector<8x64xbf16>
    %c0_52 = arith.constant 0 : index
    %c0_53 = arith.constant 0 : index
    %124 = vector.load %arg10[%c0_52, %c0_53] : memref<64x32xbf16, #tpu.memory_space<vmem>>, vector<64x32xbf16>
    %cst_54 = arith.constant dense<0.000000e+00> : vector<8x32xf32>
    %125 = tpu.matmul %123, %124, %cst_54 {dimension_numbers = #tpu.dot_dimension_numbers<[1], [0], [0], [1], [0, 0, 1, 1], [], []>} : vector<8x64xbf16>, vector<64x32xbf16>, vector<8x32xf32> -> vector<8x32xf32>
    %126 = vector.broadcast %12 : vector<1x32xf32> to vector<8x32xf32>
    %127 = arith.addf %125, %126 : vector<8x32xf32>
    %128 = arith.addf %81, %127 : vector<8x32xf32>
    %c0_55 = arith.constant 0 : index
    %c0_56 = arith.constant 0 : index
    %c0_57 = arith.constant 0 : index
    %129 = vector.load %arg11[%c0_55, %c0_56, %c0_57] : memref<1x8x32xf32, #tpu.memory_space<vmem>>, vector<1x8x32xf32>
    %130 = vector.shape_cast %129 : vector<1x8x32xf32> to vector<8x32xf32>
    %131 = vector.shape_cast %128 : vector<8x32xf32> to vector<1x8x32xf32>
    tpu.vector_store %arg11[%c0_55, %c0_56, %c0_57], %131 {strides = array<i32>} : memref<1x8x32xf32, #tpu.memory_space<vmem>>, vector<1x8x32xf32>,
    return
  }
  func.func @transform_0(%arg0: i32) -> (i32, i32, i32) {
    %c0_i32 = arith.constant 0 : i32
    %c0_i32_0 = arith.constant 0 : i32
    %c0_i32_1 = arith.constant 0 : i32
    return %arg0, %c0_i32, %c0_i32_0 : i32, i32, i32
  }
  func.func @transform_1(%arg0: i32) -> (i32, i32, i32) {
    %c0_i32 = arith.constant 0 : i32
    %c0_i32_0 = arith.constant 0 : i32
    %c0_i32_1 = arith.constant 0 : i32
    return %arg0, %c0_i32, %c0_i32_0 : i32, i32, i32
  }
  func.func @transform_2(%arg0: i32) -> (i32, i32) {
    %c0_i32 = arith.constant 0 : i32
    %c0_i32_0 = arith.constant 0 : i32
    %c0_i32_1 = arith.constant 0 : i32
    return %c0_i32, %c0_i32_0 : i32, i32
  }
  func.func @transform_3(%arg0: i32) -> (i32, i32) {
    %c0_i32 = arith.constant 0 : i32
    %c0_i32_0 = arith.constant 0 : i32
    %c0_i32_1 = arith.constant 0 : i32
    return %c0_i32, %c0_i32_0 : i32, i32
  }
  func.func @transform_4(%arg0: i32) -> (i32, i32) {
    %c0_i32 = arith.constant 0 : i32
    %c0_i32_0 = arith.constant 0 : i32
    %c0_i32_1 = arith.constant 0 : i32
    return %c0_i32, %c0_i32_0 : i32, i32
  }
  func.func @transform_5(%arg0: i32) -> (i32, i32) {
    %c0_i32 = arith.constant 0 : i32
    %c0_i32_0 = arith.constant 0 : i32
    %c0_i32_1 = arith.constant 0 : i32
    return %c0_i32, %c0_i32_0 : i32, i32
  }
  func.func @transform_6(%arg0: i32) -> (i32, i32) {
    %c0_i32 = arith.constant 0 : i32
    %c0_i32_0 = arith.constant 0 : i32
    %c0_i32_1 = arith.constant 0 : i32
    return %c0_i32, %c0_i32_0 : i32, i32
  }
  func.func @transform_7(%arg0: i32) -> (i32, i32) {
    %c0_i32 = arith.constant 0 : i32
    %c0_i32_0 = arith.constant 0 : i32
    %c0_i32_1 = arith.constant 0 : i32
    return %c0_i32, %c0_i32_0 : i32, i32
  }
  func.func @transform_8(%arg0: i32) -> (i32, i32) {
    %c0_i32 = arith.constant 0 : i32
    %c0_i32_0 = arith.constant 0 : i32
    %c0_i32_1 = arith.constant 0 : i32
    return %c0_i32, %c0_i32_0 : i32, i32
  }
  func.func @transform_9(%arg0: i32) -> (i32, i32) {
    %c0_i32 = arith.constant 0 : i32
    %c0_i32_0 = arith.constant 0 : i32
    %c0_i32_1 = arith.constant 0 : i32
    return %c0_i32, %c0_i32_0 : i32, i32
  }
  func.func @transform_10(%arg0: i32) -> (i32, i32, i32) {
    %c0_i32 = arith.constant 0 : i32
    %c0_i32_0 = arith.constant 0 : i32
    %c0_i32_1 = arith.constant 0 : i32
    return %arg0, %c0_i32, %c0_i32_0 : i32, i32, i32
  }
}

module attributes {stable_mosaic.version = 11 : i64} {
  func.func @block_kernel(%arg0: i32, %arg1: memref<1x8x32xf32, #tpu.memory_space<vmem>>, %arg2: memref<1x2x32xf32, #tpu.memory_space<vmem>>, %arg3: memref<32x32xbf16, #tpu.memory_space<vmem>>, %arg4: memref<32x32xbf16, #tpu.memory_space<vmem>>, %arg5: memref<32x32xbf16, #tpu.memory_space<vmem>>, %arg6: memref<32x32xbf16, #tpu.memory_space<vmem>>, %arg7: memref<8x32xf32, #tpu.memory_space<vmem>>, %arg8: memref<32x64xbf16, #tpu.memory_space<vmem>>, %arg9: memref<1x64xf32, #tpu.memory_space<vmem>>, %arg10: memref<64x32xbf16, #tpu.memory_space<vmem>>, %arg11: memref<1x8x32xf32, #tpu.memory_space<vmem>>) attributes {dimension_semantics = [#tpu.dimension_semantics<parallel>], iteration_bounds = array<i64: 2>, scalar_prefetch = 0 : i64, scratch_operands = 0 : i64, tpu.core_type = #tpu.core_type<tc>, window_params = [{transform_indices = @transform_0, window_bounds = array<i64: 1, 8, 32>}, {transform_indices = @transform_1, window_bounds = array<i64: 1, 2, 32>}, {pipeline_mode = #tpu.pipeline_mode<synchronous>, transform_indices = @transform_2, window_bounds = array<i64: 32, 32>}, {pipeline_mode = #tpu.pipeline_mode<synchronous>, transform_indices = @transform_3, window_bounds = array<i64: 32, 32>}, {pipeline_mode = #tpu.pipeline_mode<synchronous>, transform_indices = @transform_4, window_bounds = array<i64: 32, 32>}, {pipeline_mode = #tpu.pipeline_mode<synchronous>, transform_indices = @transform_5, window_bounds = array<i64: 32, 32>}, {pipeline_mode = #tpu.pipeline_mode<synchronous>, transform_indices = @transform_6, window_bounds = array<i64: 8, 32>}, {pipeline_mode = #tpu.pipeline_mode<synchronous>, transform_indices = @transform_7, window_bounds = array<i64: 32, 64>}, {pipeline_mode = #tpu.pipeline_mode<synchronous>, transform_indices = @transform_8, window_bounds = array<i64: 1, 64>}, {pipeline_mode = #tpu.pipeline_mode<synchronous>, transform_indices = @transform_9, window_bounds = array<i64: 64, 32>}, {transform_indices = @transform_10, window_bounds = array<i64: 1, 8, 32>}]} {
    %c0 = arith.constant 0 : index
    %c0_0 = arith.constant 0 : index
    %c0_1 = arith.constant 0 : index
    %0 = vector.load %arg1[%c0, %c0_0, %c0_1] : memref<1x8x32xf32, #tpu.memory_space<vmem>>, vector<1x8x32xf32>
    %1 = vector.shape_cast %0 : vector<1x8x32xf32> to vector<8x32xf32>
    %c0_2 = arith.constant 0 : index
    %c0_3 = arith.constant 0 : index
    %c0_4 = arith.constant 0 : index
    %2 = vector.load %arg2[%c0_2, %c0_3, %c0_4] : memref<1x2x32xf32, #tpu.memory_space<vmem>>, vector<1x1x32xf32>
    %3 = vector.shape_cast %2 : vector<1x1x32xf32> to vector<1x32xf32>
    %c0_5 = arith.constant 0 : index
    %c1 = arith.constant 1 : index
    %c0_6 = arith.constant 0 : index
    %4 = vector.load %arg2[%c0_5, %c1, %c0_6] : memref<1x2x32xf32, #tpu.memory_space<vmem>>, vector<1x1x32xf32>
    %5 = vector.shape_cast %4 : vector<1x1x32xf32> to vector<1x32xf32>
    %c0_7 = arith.constant 0 : index
    %c0_8 = arith.constant 0 : index
    %6 = vector.load %arg7[%c0_7, %c0_8] : memref<8x32xf32, #tpu.memory_space<vmem>>, vector<1x32xf32>
    %c1_9 = arith.constant 1 : index
    %c0_10 = arith.constant 0 : index
    %7 = vector.load %arg7[%c1_9, %c0_10] : memref<8x32xf32, #tpu.memory_space<vmem>>, vector<1x32xf32>
    %c2 = arith.constant 2 : index
    %c0_11 = arith.constant 0 : index
    %8 = vector.load %arg7[%c2, %c0_11] : memref<8x32xf32, #tpu.memory_space<vmem>>, vector<1x32xf32>
    %c3 = arith.constant 3 : index
    %c0_12 = arith.constant 0 : index
    %9 = vector.load %arg7[%c3, %c0_12] : memref<8x32xf32, #tpu.memory_space<vmem>>, vector<1x32xf32>
    %c4 = arith.constant 4 : index
    %c0_13 = arith.constant 0 : index
    %10 = vector.load %arg7[%c4, %c0_13] : memref<8x32xf32, #tpu.memory_space<vmem>>, vector<1x32xf32>
    %c5 = arith.constant 5 : index
    %c0_14 = arith.constant 0 : index
    %11 = vector.load %arg7[%c5, %c0_14] : memref<8x32xf32, #tpu.memory_space<vmem>>, vector<1x32xf32>
    %c6 = arith.constant 6 : index
    %c0_15 = arith.constant 0 : index
    %12 = vector.load %arg7[%c6, %c0_15] : memref<8x32xf32, #tpu.memory_space<vmem>>, vector<1x32xf32>
    %cst = arith.constant dense<0.000000e+00> : vector<8xf32>
    %13 = vector.multi_reduction <add>, %1, %cst [1] : vector<8x32xf32> to vector<8xf32>
    %14 = vector.shape_cast %13 : vector<8xf32> to vector<8x1xf32>
    %cst_16 = arith.constant 3.200000e+01 : f32
    %15 = vector.broadcast %cst_16 : f32 to vector<8x1xf32>
    %16 = arith.divf %14, %15 : vector<8x1xf32>
    %17 = vector.broadcast %16 : vector<8x1xf32> to vector<8x32xf32>
    %18 = arith.subf %1, %17 : vector<8x32xf32>
    %19 = arith.mulf %18, %18 : vector<8x32xf32>
    %cst_17 = arith.constant dense<0.000000e+00> : vector<8xf32>
    %20 = vector.multi_reduction <add>, %19, %cst_17 [1] : vector<8x32xf32> to vector<8xf32>
    %21 = vector.shape_cast %20 : vector<8xf32> to vector<8x1xf32>
    %cst_18 = arith.constant 3.200000e+01 : f32
    %22 = vector.broadcast %cst_18 : f32 to vector<8x1xf32>
    %23 = arith.divf %21, %22 : vector<8x1xf32>
    %24 = vector.broadcast %16 : vector<8x1xf32> to vector<8x32xf32>
    %25 = arith.subf %1, %24 : vector<8x32xf32>
    %cst_19 = arith.constant 9.99999974E-6 : f32
    %26 = vector.broadcast %cst_19 : f32 to vector<8x1xf32>
    %27 = arith.addf %23, %26 : vector<8x1xf32>
    %28 = math.rsqrt %27 : vector<8x1xf32>
    %29 = vector.broadcast %28 : vector<8x1xf32> to vector<8x32xf32>
    %30 = arith.mulf %25, %29 : vector<8x32xf32>
    %cst_20 = arith.constant 1.000000e+00 : f32
    %31 = vector.broadcast %cst_20 : f32 to vector<1x32xf32>
    %32 = arith.addf %31, %3 : vector<1x32xf32>
    %33 = vector.broadcast %32 : vector<1x32xf32> to vector<8x32xf32>
    %34 = arith.mulf %30, %33 : vector<8x32xf32>
    %35 = vector.broadcast %5 : vector<1x32xf32> to vector<8x32xf32>
    %36 = arith.addf %34, %35 : vector<8x32xf32>
    %37 = arith.truncf %36 : vector<8x32xf32> to vector<8x32xbf16>
    %c0_21 = arith.constant 0 : index
    %c0_22 = arith.constant 0 : index
    %38 = vector.load %arg3[%c0_21, %c0_22] : memref<32x32xbf16, #tpu.memory_space<vmem>>, vector<32x32xbf16>
    %cst_23 = arith.constant dense<0.000000e+00> : vector<8x32xf32>
    %39 = tpu.matmul %37, %38, %cst_23 {dimension_numbers = #tpu.dot_dimension_numbers<[1], [0], [0], [1], [0, 0, 1, 1], [], []>} : vector<8x32xbf16>, vector<32x32xbf16>, vector<8x32xf32> -> vector<8x32xf32>
    %40 = vector.broadcast %6 : vector<1x32xf32> to vector<8x32xf32>
    %41 = arith.addf %39, %40 : vector<8x32xf32>
    %c0_24 = arith.constant 0 : index
    %c0_25 = arith.constant 0 : index
    %42 = vector.load %arg4[%c0_24, %c0_25] : memref<32x32xbf16, #tpu.memory_space<vmem>>, vector<32x32xbf16>
    %cst_26 = arith.constant dense<0.000000e+00> : vector<8x32xf32>
    %43 = tpu.matmul %37, %42, %cst_26 {dimension_numbers = #tpu.dot_dimension_numbers<[1], [0], [0], [1], [0, 0, 1, 1], [], []>} : vector<8x32xbf16>, vector<32x32xbf16>, vector<8x32xf32> -> vector<8x32xf32>
    %44 = vector.broadcast %7 : vector<1x32xf32> to vector<8x32xf32>
    %45 = arith.addf %43, %44 : vector<8x32xf32>
    %c0_27 = arith.constant 0 : index
    %c0_28 = arith.constant 0 : index
    %46 = vector.load %arg5[%c0_27, %c0_28] : memref<32x32xbf16, #tpu.memory_space<vmem>>, vector<32x32xbf16>
    %cst_29 = arith.constant dense<0.000000e+00> : vector<8x32xf32>
    %47 = tpu.matmul %37, %46, %cst_29 {dimension_numbers = #tpu.dot_dimension_numbers<[1], [0], [0], [1], [0, 0, 1, 1], [], []>} : vector<8x32xbf16>, vector<32x32xbf16>, vector<8x32xf32> -> vector<8x32xf32>
    %48 = vector.broadcast %8 : vector<1x32xf32> to vector<8x32xf32>
    %49 = arith.addf %47, %48 : vector<8x32xf32>
    %50 = vector.shape_cast %41 : vector<8x32xf32> to vector<8x4x8xf32>
    %51 = tpu.transpose %50, [1, 0, 2] : vector<8x4x8xf32> -> vector<4x8x8xf32>
    %52 = arith.truncf %51 : vector<4x8x8xf32> to vector<4x8x8xbf16>
    %53 = vector.shape_cast %45 : vector<8x32xf32> to vector<8x4x8xf32>
    %54 = tpu.transpose %53, [1, 0, 2] : vector<8x4x8xf32> -> vector<4x8x8xf32>
    %55 = arith.truncf %54 : vector<4x8x8xf32> to vector<4x8x8xbf16>
    %56 = vector.shape_cast %49 : vector<8x32xf32> to vector<8x4x8xf32>
    %57 = tpu.transpose %56, [1, 0, 2] : vector<8x4x8xf32> -> vector<4x8x8xf32>
    %58 = arith.truncf %57 : vector<4x8x8xf32> to vector<4x8x8xbf16>
    "tpu.trace_start"() <{level = 10 : i32, message = "hqd,hkd->hqk"}> : () -> ()
    %cst_30 = arith.constant dense<0.000000e+00> : vector<4x8x8xf32>
    %59 = tpu.matmul %52, %55, %cst_30 {dimension_numbers = #tpu.dot_dimension_numbers<[2], [2], [1], [1], [0, 0, 0, 1, 1, 1], [0], [0]>} : vector<4x8x8xbf16>, vector<4x8x8xbf16>, vector<4x8x8xf32> -> vector<4x8x8xf32>
    "tpu.trace_stop"() : () -> ()
    %cst_31 = arith.constant 0.353553385 : f32
    %60 = vector.broadcast %cst_31 : f32 to vector<4x8x8xf32>
    %61 = arith.mulf %59, %60 : vector<4x8x8xf32>
    %cst_32 = arith.constant dense<0xFF800000> : vector<4x8xf32>
    %62 = vector.multi_reduction <maximumf>, %61, %cst_32 [2] : vector<4x8x8xf32> to vector<4x8xf32>
    %63 = vector.shape_cast %62 : vector<4x8xf32> to vector<4x8x1xf32>
    %64 = vector.broadcast %63 : vector<4x8x1xf32> to vector<4x8x8xf32>
    %65 = arith.subf %61, %64 : vector<4x8x8xf32>
    %66 = math.exp %65 : vector<4x8x8xf32>
    %cst_33 = arith.constant dense<0.000000e+00> : vector<4x8xf32>
    %67 = vector.multi_reduction <add>, %66, %cst_33 [2] : vector<4x8x8xf32> to vector<4x8xf32>
    %68 = vector.shape_cast %67 : vector<4x8xf32> to vector<4x8x1xf32>
    %69 = tpu.reciprocal %68 {approx = true} : vector<4x8x1xf32> -> vector<4x8x1xf32>
    %70 = vector.broadcast %69 : vector<4x8x1xf32> to vector<4x8x8xf32>
    %71 = arith.mulf %66, %70 : vector<4x8x8xf32>
    %72 = arith.truncf %71 : vector<4x8x8xf32> to vector<4x8x8xbf16>
    "tpu.trace_start"() <{level = 10 : i32, message = "hqk,hkd->hqd"}> : () -> ()
    %cst_34 = arith.constant dense<0.000000e+00> : vector<4x8x8xf32>
    %73 = tpu.matmul %72, %58, %cst_34 {dimension_numbers = #tpu.dot_dimension_numbers<[2], [1], [1], [2], [0, 0, 0, 1, 1, 2], [0], [0]>} : vector<4x8x8xbf16>, vector<4x8x8xbf16>, vector<4x8x8xf32> -> vector<4x8x8xf32>
    "tpu.trace_stop"() : () -> ()
    %74 = tpu.transpose %73, [1, 0, 2] : vector<4x8x8xf32> -> vector<8x4x8xf32>
    %75 = vector.shape_cast %74 : vector<8x4x8xf32> to vector<8x32xf32>
    %76 = arith.truncf %75 : vector<8x32xf32> to vector<8x32xbf16>
    %c0_35 = arith.constant 0 : index
    %c0_36 = arith.constant 0 : index
    %77 = vector.load %arg6[%c0_35, %c0_36] : memref<32x32xbf16, #tpu.memory_space<vmem>>, vector<32x32xbf16>
    %cst_37 = arith.constant dense<0.000000e+00> : vector<8x32xf32>
    %78 = tpu.matmul %76, %77, %cst_37 {dimension_numbers = #tpu.dot_dimension_numbers<[1], [0], [0], [1], [0, 0, 1, 1], [], []>} : vector<8x32xbf16>, vector<32x32xbf16>, vector<8x32xf32> -> vector<8x32xf32>
    %79 = vector.broadcast %9 : vector<1x32xf32> to vector<8x32xf32>
    %80 = arith.addf %78, %79 : vector<8x32xf32>
    %81 = arith.addf %1, %80 : vector<8x32xf32>
    %cst_38 = arith.constant dense<0.000000e+00> : vector<8xf32>
    %82 = vector.multi_reduction <add>, %81, %cst_38 [1] : vector<8x32xf32> to vector<8xf32>
    %83 = vector.shape_cast %82 : vector<8xf32> to vector<8x1xf32>
    %cst_39 = arith.constant 3.200000e+01 : f32
    %84 = vector.broadcast %cst_39 : f32 to vector<8x1xf32>
    %85 = arith.divf %83, %84 : vector<8x1xf32>
    %86 = vector.broadcast %85 : vector<8x1xf32> to vector<8x32xf32>
    %87 = arith.subf %81, %86 : vector<8x32xf32>
    %88 = arith.mulf %87, %87 : vector<8x32xf32>
    %cst_40 = arith.constant dense<0.000000e+00> : vector<8xf32>
    %89 = vector.multi_reduction <add>, %88, %cst_40 [1] : vector<8x32xf32> to vector<8xf32>
    %90 = vector.shape_cast %89 : vector<8xf32> to vector<8x1xf32>
    %cst_41 = arith.constant 3.200000e+01 : f32
    %91 = vector.broadcast %cst_41 : f32 to vector<8x1xf32>
    %92 = arith.divf %90, %91 : vector<8x1xf32>
    %93 = vector.broadcast %85 : vector<8x1xf32> to vector<8x32xf32>
    %94 = arith.subf %81, %93 : vector<8x32xf32>
    %cst_42 = arith.constant 9.99999974E-6 : f32
    %95 = vector.broadcast %cst_42 : f32 to vector<8x1xf32>
    %96 = arith.addf %92, %95 : vector<8x1xf32>
    %97 = math.rsqrt %96 : vector<8x1xf32>
    %98 = vector.broadcast %97 : vector<8x1xf32> to vector<8x32xf32>
    %99 = arith.mulf %94, %98 : vector<8x32xf32>
    %100 = vector.broadcast %10 : vector<1x32xf32> to vector<8x32xf32>
    %101 = arith.mulf %99, %100 : vector<8x32xf32>
    %102 = vector.broadcast %11 : vector<1x32xf32> to vector<8x32xf32>
    %103 = arith.addf %101, %102 : vector<8x32xf32>
    %104 = arith.truncf %103 : vector<8x32xf32> to vector<8x32xbf16>
    %c0_43 = arith.constant 0 : index
    %c0_44 = arith.constant 0 : index
    %105 = vector.load %arg8[%c0_43, %c0_44] : memref<32x64xbf16, #tpu.memory_space<vmem>>, vector<32x64xbf16>
    %cst_45 = arith.constant dense<0.000000e+00> : vector<8x64xf32>
    %106 = tpu.matmul %104, %105, %cst_45 {dimension_numbers = #tpu.dot_dimension_numbers<[1], [0], [0], [1], [0, 0, 1, 1], [], []>} : vector<8x32xbf16>, vector<32x64xbf16>, vector<8x64xf32> -> vector<8x64xf32>
    %c0_46 = arith.constant 0 : index
    %c0_47 = arith.constant 0 : index
    %107 = vector.load %arg9[%c0_46, %c0_47] : memref<1x64xf32, #tpu.memory_space<vmem>>, vector<1x64xf32>
    %108 = vector.broadcast %107 : vector<1x64xf32> to vector<8x64xf32>
    %109 = arith.addf %106, %108 : vector<8x64xf32>
    %cst_48 = arith.constant 5.000000e-01 : f32
    %110 = vector.broadcast %cst_48 : f32 to vector<8x64xf32>
    %111 = arith.mulf %110, %109 : vector<8x64xf32>
    %cst_49 = arith.constant 4.471500e-02 : f32
    %112 = vector.broadcast %cst_49 : f32 to vector<8x64xf32>
    %113 = arith.mulf %112, %109 : vector<8x64xf32>
    %114 = arith.mulf %113, %109 : vector<8x64xf32>
    %115 = arith.mulf %114, %109 : vector<8x64xf32>
    %116 = arith.addf %109, %115 : vector<8x64xf32>
    %cst_50 = arith.constant 0.797884583 : f32
    %117 = vector.broadcast %cst_50 : f32 to vector<8x64xf32>
    %118 = arith.mulf %117, %116 : vector<8x64xf32>
    %119 = math.tanh %118 : vector<8x64xf32>
    %cst_51 = arith.constant 1.000000e+00 : f32
    %120 = vector.broadcast %cst_51 : f32 to vector<8x64xf32>
    %121 = arith.addf %120, %119 : vector<8x64xf32>
    %122 = arith.mulf %111, %121 : vector<8x64xf32>
    %123 = arith.truncf %122 : vector<8x64xf32> to vector<8x64xbf16>
    %c0_52 = arith.constant 0 : index
    %c0_53 = arith.constant 0 : index
    %124 = vector.load %arg10[%c0_52, %c0_53] : memref<64x32xbf16, #tpu.memory_space<vmem>>, vector<64x32xbf16>
    %cst_54 = arith.constant dense<0.000000e+00> : vector<8x32xf32>
    %125 = tpu.matmul %123, %124, %cst_54 {dimension_numbers = #tpu.dot_dimension_numbers<[1], [0], [0], [1], [0, 0, 1, 1], [], []>} : vector<8x64xbf16>, vector<64x32xbf16>, vector<8x32xf32> -> vector<8x32xf32>
    %126 = vector.broadcast %12 : vector<1x32xf32> to vector<8x32xf32>
    %127 = arith.addf %125, %126 : vector<8x32xf32>
    %128 = arith.addf %81, %127 : vector<8x32xf32>
    %c0_55 = arith.constant 0 : index
    %c0_56 = arith.constant 0 : index
    %c0_57 = arith.constant 0 : index
    %129 = vector.load %arg11[%c0_55, %c0_56, %c0_57] : memref<1x8x32xf32, #tpu.memory_space<vmem>>, vector<1x8x32xf32>
    %130 = vector.shape_cast %129 : vector<1x8x32xf32> to vector<8x32xf32>
    %131 = vector.shape_cast %128 : vector<8x32xf32> to vector<1x8x32xf32>
    tpu.vector_store %arg11[%c0_55, %c0_56, %c0_57], %131 {strides = array<i32>} : memref<1x8x32xf32, #tpu.memory_space<vmem>>, vector<1x8x32xf32>,
    return
  }
  func.func @transform_0(%arg0: i32) -> (i32, i32, i32) {
    %c0_i32 = arith.constant 0 : i32
    %c0_i32_0 = arith.constant 0 : i32
    %c0_i32_1 = arith.constant 0 : i32
    return %arg0, %c0_i32, %c0_i32_0 : i32, i32, i32
  }
  func.func @transform_1(%arg0: i32) -> (i32, i32, i32) {
    %c0_i32 = arith.constant 0 : i32
    %c0_i32_0 = arith.constant 0 : i32
    %c0_i32_1 = arith.constant 0 : i32
    return %arg0, %c0_i32, %c0_i32_0 : i32, i32, i32
  }
  func.func @transform_2(%arg0: i32) -> (i32, i32) {
    %c0_i32 = arith.constant 0 : i32
    %c0_i32_0 = arith.constant 0 : i32
    %c0_i32_1 = arith.constant 0 : i32
    return %c0_i32, %c0_i32_0 : i32, i32
  }
  func.func @transform_3(%arg0: i32) -> (i32, i32) {
    %c0_i32 = arith.constant 0 : i32
    %c0_i32_0 = arith.constant 0 : i32
    %c0_i32_1 = arith.constant 0 : i32
    return %c0_i32, %c0_i32_0 : i32, i32
  }
  func.func @transform_4(%arg0: i32) -> (i32, i32) {
    %c0_i32 = arith.constant 0 : i32
    %c0_i32_0 = arith.constant 0 : i32
    %c0_i32_1 = arith.constant 0 : i32
    return %c0_i32, %c0_i32_0 : i32, i32
  }
  func.func @transform_5(%arg0: i32) -> (i32, i32) {
    %c0_i32 = arith.constant 0 : i32
    %c0_i32_0 = arith.constant 0 : i32
    %c0_i32_1 = arith.constant 0 : i32
    return %c0_i32, %c0_i32_0 : i32, i32
  }
  func.func @transform_6(%arg0: i32) -> (i32, i32) {
    %c0_i32 = arith.constant 0 : i32
    %c0_i32_0 = arith.constant 0 : i32
    %c0_i32_1 = arith.constant 0 : i32
    return %c0_i32, %c0_i32_0 : i32, i32
  }
  func.func @transform_7(%arg0: i32) -> (i32, i32) {
    %c0_i32 = arith.constant 0 : i32
    %c0_i32_0 = arith.constant 0 : i32
    %c0_i32_1 = arith.constant 0 : i32
    return %c0_i32, %c0_i32_0 : i32, i32
  }
  func.func @transform_8(%arg0: i32) -> (i32, i32) {
    %c0_i32 = arith.constant 0 : i32
    %c0_i32_0 = arith.constant 0 : i32
    %c0_i32_1 = arith.constant 0 : i32
    return %c0_i32, %c0_i32_0 : i32, i32
  }
  func.func @transform_9(%arg0: i32) -> (i32, i32) {
    %c0_i32 = arith.constant 0 : i32
    %c0_i32_0 = arith.constant 0 : i32
    %c0_i32_1 = arith.constant 0 : i32
    return %c0_i32, %c0_i32_0 : i32, i32
  }
  func.func @transform_10(%arg0: i32) -> (i32, i32, i32) {
    %c0_i32 = arith.constant 0 : i32
    %c0_i32_0 = arith.constant 0 : i32
    %c0_i32_1 = arith.constant 0 : i32
    return %arg0, %c0_i32, %c0_i32_0 : i32, i32, i32
  }
}

</mosaic_0001>

<bundles_post_ra>
// kernel: tpu_custom_call.1
= control target key start
LH: loop header
LB: loop body
LE: loop exit
PB: predicated region body
PF: predicated region fallthrough
CT: control target
= control target key end

     0   :  { %s3204_s0 = inlined_call_operand.vmem [shape: f32[2,8,32], index: 0, kind: input, shape index: {}]   ;;  %s3205_s1 = inlined_call_operand.hbm [shape: f32[2,2,32], index: 1, kind: input, shape index: {}]   ;;  %s3206_s2 = inlined_call_operand.vmem [shape: bf16[32,32], index: 2, kind: input, shape index: {}]   ;;  %s3207_s3 = inlined_call_operand.vmem [shape: bf16[32,32], index: 3, kind: input, shape index: {}]   ;;  %s3208_s4 = inlined_call_operand.hbm [shape: bf16[32,32], index: 4, kind: input, shape index: {}]   ;;  %s3209_s5 = inlined_call_operand.hbm [shape: bf16[32,32], index: 5, kind: input, shape index: {}]   ;;  %s3210_s6 = inlined_call_operand.hbm [shape: f32[8,32], index: 6, kind: input, shape index: {}]   ;;  %s3211_s7 = inlined_call_operand.hbm [shape: bf16[32,64], index: 7, kind: input, shape index: {}]   ;;  %s3212_s8 = inlined_call_operand.hbm [shape: f32[1,64], index: 8, kind: input, shape index: {}]   ;;  %s3213_s9 = inlined_call_operand.vmem [shape: bf16[64,32], index: 9, kind: input, shape index: {}]   ;;  %s3214_s10 = inlined_call_operand.hbm [shape: f32[2,8,32], index: 10, kind: output, shape index: {}]  }
   0x1   :  { %3219 = sst [smem:[#allocation19_spill]] %s3208_s4 }
   0x2   :  { %3220 = sst [smem:[#allocation20_spill]] %s3209_s5 }
   0x3   :  { %3221 = sst [smem:[#allocation21_spill]] %s3210_s6 }
   0x4   :  { %3222 = sst [smem:[#allocation22_spill]] %s3211_s7 }
   0x5   :  { %3223 = sst [smem:[#allocation23_spill]] %s3212_s8 }
   0x6   :  { %15 = vsyncpa [#allocation3], 0 }
   0x7   :  { %17 = vsyncpa [#allocation3 + $0x1], 0 }
   0x8   :  { %18 = vsyncpa [#allocation6], 0 }
   0x9   :  { %19 = vsyncpa [#allocation9], 0 }
   0xa   :  { %20 = vsyncpa [#allocation12], 0 }
   0xb   :  { %21 = vsyncpa [#allocation4], 0 }
   0xc   :  { %23 = vsyncpa [#allocation4 + $0x1], 0  ;;  %s2757_s13 = smov 0   ;;  %s2759_s14 = smov 0  }
   0xd   :  { %s2761_s15 = smov 0   ;;  %s2763_s16 = smov 0  }
   0xe LB: > { %s2683_s17 = smov [#allocation5]   ;;  %s2778_s19 = sadd.s32 4294967295, %s2681_s16   ;;  %s2681_s16 = sphi %s2763_s16, %s3250_s16   ;;  %s2677_s15 = sphi %s2761_s15, %s3249_s15   ;;  %s2673_s14 = sphi %s2759_s14, %s3248_s14   ;;  %s2669_s13 = sphi %s2757_s13, %s3247_s13  }
   0xf   : > { %s298_s18 = sshll.u32 %s2683_s17, 4  ;;  %p2099_p0 = scmp.ge.s32.totalorder %s2681_s16, 1  ;;  %s299_s18 = int_to_ptr.vmem [resolvable:$true] %s298_s18 }
  0x10   : > { %p3215_p1 = scmp.eq.s32.totalorder %s2778_s19, 0  ;;  %p280_p2 = scmp.lt.s32.totalorder %s2681_s16, 3 }
  0x11   : > { %s2684_s21 = smov [#allocation8]   ;;  %s2685_s24 = smov [#allocation7]  }
  0x12   : > { %p2783_p3 = pnand %p2099_p0, %p280_p2  ;;  %s325_s22 = sshll.u32 %s2684_s21, 4  ;;  %s326_s22 = int_to_ptr.vmem [resolvable:$true] %s325_s22 }
  0x13   : > { %s311_s25 = sshll.u32 %s2685_s24, 4  ;;  %s2458_s27 = scalar_lea.vmem %s299_s18, 256  ;;  %s2796_s25 = int_to_ptr.vmem [resolvable:$true] %s311_s25 }
  0x14   : > { %s3224_s20 = scalar_select %p2783_p3, 1, 0 }
  0x15   : > { %p2326_p5 = pneg %p2783_p3  ;;  %p2459_p8 = scmp.ne.s32.totalorder %s299_s18, %s2458_s27 }
  0x16   : > { %p2466_p11 = scmp.lt.s32.totalorder %s299_s18, %s299_s18  ;;  %p2467_p12 = scmp.lt.s32.totalorder %s2458_s27, %s2458_s27 }
  0x17   : > { %p2792_p6 = pnand %p2326_p5, %p3215_p1 }
  0x18   : > { %p2468_p13 = por %p2467_p12, %p2466_p11 }
  0x19   : > { %p2800_p7 = pneg %p2792_p6 }
  0x1b   : > { %p2461_p9 = pnand %p2459_p8, %p2800_p7 }
  0x1d   : > { %p2462_p10 = pneg %p2461_p9 }
  0x1f   : > { %p2469_p0 = pnand %p2468_p13, %p2462_p10 }
  0x21   : > { %2472 = shalt.err (!%p2469_p0)
}
  0x22   : > { %s2686_s28 = smov 64   ;;  %s2687_s29 = smov 4  }
  0x23   : > { %s3227_s4 = sld [smem:[#allocation19_spill]]  ;;  %s2484_s12 = scalar_lea.vmem %s326_s22, 128 }
  0x24   : > { %p2485_p2 = scmp.ne.s32.totalorder %s326_s22, %s2484_s12  ;;  %p2492_p9 = scmp.lt.s32.totalorder %s326_s22, %s326_s22 }
  0x25   : > { %p2493_p10 = scmp.lt.s32.totalorder %s2484_s12, %s2484_s12 }
  0x26   : > { %p2487_p5 = pnand %p2485_p2, %p2800_p7 }
  0x27   : > { %p2494_p11 = por %p2493_p10, %p2492_p9 }
  0x28   : > { %p2488_p8 = pneg %p2487_p5 }
  0x29   : > { %2329 = dma.hbm_to_vmem [thread:$0]  (!%p2792_p6), %s3227_s4, 256, %s299_s18, [#allocation6], %s2686_s28, %s2686_s28, %s2687_s29  }
  0x2a   : > { %p2495_p12 = pnand %p2494_p11, %p2488_p8 }
  0x2c   : > { %2498 = shalt.err (!%p2495_p12)
}
  0x2d   : > { %s3228_s6 = sld [smem:[#allocation21_spill]]  ;;  %s2510_s18 = scalar_lea.vmem %s2796_s25, 256 }
  0x2e   : > { %p2511_p13 = scmp.ne.s32.totalorder %s2796_s25, %s2510_s18  ;;  %p2518_p5 = scmp.lt.s32.totalorder %s2796_s25, %s2796_s25 }
  0x2f   : > { %p2519_p9 = scmp.lt.s32.totalorder %s2510_s18, %s2510_s18 }
  0x30   : > { %p2513_p0 = pnand %p2511_p13, %p2800_p7 }
  0x31   : > { %p2520_p8 = por %p2519_p9, %p2518_p5 }
  0x32   : > { %p2514_p2 = pneg %p2513_p0 }
  0x33   : > { %2335 = dma.hbm_to_vmem [thread:$0]  (!%p2792_p6), %s3228_s6, 128, %s326_s22, [#allocation9]  }
  0x34   : > { %p2521_p10 = pnand %p2520_p8, %p2514_p2 }
  0x36   : > { %2524 = shalt.err (!%p2521_p10)
}
  0x37   : > { %s3229_s5 = sld [smem:[#allocation20_spill]]  ;;  %s2688_s22 = smov [#allocation10]  }
  0x38   : > { %s335_s30 = sshll.u32 %s2688_s22, 4  ;;  %s2689_s11 = smov [#allocation11]   ;;  %s336_s30 = int_to_ptr.vmem [resolvable:$true] %s335_s30 }
  0x39   : > { %s349_s12 = sshll.u32 %s2689_s11, 4  ;;  %s2536_s17 = scalar_lea.vmem %s336_s30, 256  ;;  %s350_s12 = int_to_ptr.vmem [resolvable:$true] %s349_s12 }
  0x3a   : > { %p2537_p11 = scmp.ne.s32.totalorder %s336_s30, %s2536_s17  ;;  %p2544_p0 = scmp.lt.s32.totalorder %s336_s30, %s336_s30 }
  0x3b   : > { %p2545_p2 = scmp.lt.s32.totalorder %s2536_s17, %s2536_s17 }
  0x3c   : > { %p2539_p12 = pnand %p2537_p11, %p2800_p7 }
  0x3d   : > { %2332 = dma.hbm_to_vmem [thread:$0]  (!%p2792_p6), %s3229_s5, 256, %s2796_s25, [#allocation6], %s2686_s28, %s2686_s28, %s2687_s29  }
  0x3e   : > { %p2540_p13 = pneg %p2539_p12  ;;  %p2546_p5 = por %p2545_p2, %p2544_p0 }
  0x40   : > { %p2547_p9 = pnand %p2546_p5, %p2540_p13 }
  0x42   : > { %2550 = shalt.err (!%p2547_p9)
}
  0x43   : > { %s3230_s7 = sld [smem:[#allocation22_spill]]  ;;  %s2562_s18 = scalar_lea.vmem %s350_s12, 16 }
  0x44   : > { %p2563_p8 = scmp.ne.s32.totalorder %s350_s12, %s2562_s18  ;;  %s2569_s24 = scalar_lea.vmem %s350_s12, 32 }
  0x45   : > { %p2570_p12 = scmp.lt.s32.totalorder %s350_s12, %s350_s12  ;;  %p2571_p13 = scmp.lt.s32.totalorder %s2569_s24, %s2562_s18 }
  0x46   : > { %p2565_p10 = pnand %p2563_p8, %p2800_p7 }
  0x47   : > { %p2572_p0 = por %p2571_p13, %p2570_p12 }
  0x48   : > { %p2566_p11 = pneg %p2565_p10 }
  0x49   : > { %2338 = dma.hbm_to_vmem [thread:$0]  (!%p2792_p6), %s3230_s7, 256, %s336_s30, [#allocation9], %s2686_s28, %s2686_s28, %s2687_s29  }
  0x4a   : > { %p2573_p2 = pnand %p2572_p0, %p2566_p11 }
  0x4c   : > { %2576 = shalt.err (!%p2573_p2)
}
  0x4d   : > { %s3231_s8 = sld [smem:[#allocation23_spill]]  ;;  %s2098_s26 = sadd.s32 4294967294, %s2681_s16  }
  0x4e   : > { %s2855_s23 = sadd.s32 1, %s2681_s16   ;;  %s62_s28 = sadd.s32 1, %s2677_s15 }
  0x4f   : > { %s59_s29 = ssub.s32 %s2681_s16, %s2855_s23  ;;  %p69_p7 = scmp.ne.s32.totalorder %s2677_s15, %s2673_s14 }
  0x50   : > { %p60_p5 = scmp.eq.s32.totalorder %s59_s29, 0  ;;  %p70_p9 = scmp.eq.s32.totalorder %s2681_s16, 0 }
  0x51   : > { %p75_p8 = scmp.ne.s32.totalorder %s2673_s14, %s2669_s13  ;;  %p267_p10 = scmp.eq.s32.totalorder %s2778_s19, 1 }
  0x52   : > { %s2867_s30 = scalar_select %p60_p5, %s2677_s15, %s62_s28  }
  0x53   : > { %2341 = dma.hbm_to_vmem [thread:$0]  (!%p2792_p6), %s3231_s8, 16, %s350_s12, [#allocation12]  }
  0x54   : > { %p71_p11 = por %p70_p9, %p69_p7  ;;  %p2871_p12 = por %p3215_p1, %p75_p8 }
  0x55   : > { %p2875_p6 = por %p267_p10, %p69_p7  ;;  %p273_p13 = scmp.eq.s32.totalorder %s2098_s26, 1 }
  0x56   : > { %s3232_s11 = scalar_select %p2871_p12, 1, 0 }
  0x57   : > { %s3233_s12 = scalar_select %p2875_p6, 1, 0 }
  0x58   : > { %p2355_p0 = scmp.lt.s32.totalorder %s2681_s16, 2  ;;  %s370_s17 = sand.u32 1, %s2677_s15  }
  0x59   : > { %p2881_p2 = por %p273_p13, %p75_p8  ;;  %s2106_s21 = sshll.u32 %s370_s17, 1 }
  0x5a   : > { %s2107_s18 = sshll.u32 %s2681_s16, 5  ;;  %s374_s28 = scalar_lea.vmem [#allocation2], %s2106_s21 }
  0x5b   : > { %s3234_s25 = scalar_select %p2881_p2, 1, 0 }
  0x5c   : > { %s2889_s22 = scalar_lea.hbm %s3205_s1, %s2107_s18  ;;  %s381_s29 = sshll.u32 %s374_s28, 4  ;;  %s382_s29 = int_to_ptr.vmem [resolvable:$true] %s381_s29 }
  0x5d   : > { %p2891_p7 = pnand %p2355_p0, %p71_p11  ;;  %s371_s4 = scalar_lea.sflag [#allocation3], %s370_s17 }
  0x5e   : > { %s2577_s5 = scalar_lea.hbm %s2889_s22, 32  ;;  %s2582_s27 = scalar_lea.hbm %s3205_s1, 64 }
  0x5f   : > { %p2578_p5 = scmp.ne.s32.totalorder %s2889_s22, %s2577_s5  ;;  %p2579_p9 = pneg %p2891_p7 }
  0x60   : > { %p2583_p11 = scmp.lt.s32.totalorder %s2889_s22, %s3205_s1  ;;  %p2584_p13 = scmp.lt.s32.totalorder %s2582_s27, %s2577_s5 }
  0x61   : > { %p2580_p8 = pnand %p2579_p9, %p2578_p5 }
  0x62   : > { %p2585_p0 = por %p2584_p13, %p2583_p11 }
  0x63   : > { %p2581_p10 = pneg %p2580_p8 }
  0x65   : > { %p2586_p4 = pnand %p2585_p0, %p2581_p10 }
  0x67   : > { %2589 = shalt.err (!%p2586_p4)
}
  0x68   : > { %s2590_s28 = scalar_lea.vmem %s382_s29, 32  ;;  %s2690_s17 = smov [#allocation2]  }
  0x69   : > { %p2591_p1 = scmp.ne.s32.totalorder %s382_s29, %s2590_s28  ;;  %s2595_s7 = sshll.u32 %s2690_s17, 4  ;;  %s2596_s7 = int_to_ptr.vmem [resolvable:$false] %s2595_s7 }
  0x6a   : > { %s2597_s8 = scalar_lea.vmem %s2596_s7, 64  ;;  %p2598_p5 = scmp.lt.s32.totalorder %s382_s29, %s2596_s7 }
  0x6b   : > { %p2593_p2 = pnand %p2591_p1, %p2579_p9  ;;  %p2599_p8 = scmp.lt.s32.totalorder %s2597_s8, %s2590_s28 }
  0x6d   : > { %p2594_p6 = pneg %p2593_p2  ;;  %p2600_p12 = por %p2599_p8, %p2598_p5 }
  0x6f   : > { %p2601_p3 = pnand %p2600_p12, %p2594_p6 }
  0x71   : > { %2604 = shalt.err (!%p2601_p3)
}
  0x72   : > { %2345 = dma.hbm_to_vmem [thread:$0]  (!%p2891_p7), %s2889_s22, 32, %s382_s29, %s371_s4  }
  0x73   : > { %p3236_p10 = scmp.ne.s32.totalorder %s3224_s20, 0 }
  0x74   : > { %s2912_s5 = sand.u32 (!%p3236_p10), 1, %s2673_s14   ;;  %p3237_p1 = scmp.ne.s32.totalorder (!%p3236_p10), %s3232_s11, 0 }
  0x75   : > { %390 = sbr.rel (%p3236_p10) target bundleno = 2634 (0xa4a), region = 60  ;;  %s2109_s6 = sshll.u32 (!%p3236_p10), %s2912_s5, 1 }
  0x76   : > { %s393_s18 = scalar_lea.sflag (!%p3236_p10), [#allocation3], %s2912_s5  ;;  %s2916_s7 = scalar_lea.vmem (!%p3236_p10), [#allocation2], %s2109_s6 }
  0x7a   : > { %2648 = dma.done.wait (%p3237_p1), %s393_s18, 32  }
  0x7b   : > { %2650 = vsyncadd (%p3237_p1), %s393_s18, 4294967264  ;;  %p3238_p3 = scmp.eq.s32.totalorder %s2778_s19, 0 }
  0x7d   : > { %2652 = dma.done.wait (%p3238_p3), [#allocation6], 512   ;;  %p3239_p4 = pmov %p3238_p3 }
  0x7e   : > { %p3240_p12 = pmov %p3238_p3 }
  0x7f   : > { %2654 = vsyncadd (%p3239_p4), [#allocation6], 4294966784 }
  0x80   : > { %2656 = dma.done.wait (%p3240_p12), [#allocation9], 384   ;;  %p3241_p6 = pmov %p3238_p3 }
  0x81   : > { %p3242_p2 = pmov %p3238_p3 }
  0x82   : > { %2658 = vsyncadd (%p3241_p6), [#allocation9], 4294966912 }
  0x83   : > { %2660 = dma.done.wait (%p3242_p2), [#allocation12], 16   ;;  %p3243_p7 = pmov %p3242_p2 }
  0x84   : > { %p457_p9 = scmp.lt.s32.totalorder %s2778_s19, 1  ;;  %vm472_vm0 = vcmask 261120   ;;  %v2411_v7 = vld [vmem:[%s3206_s2 + $0x8] sm:$0xff]   ;;  %v2691_v9 = vmov 0.0   ;;  %v2413_v10 = vld [vmem:[%s3206_s2] sm:$0xff]   ;;  %vm2692_vm1 = vmmov 0   ;;  %v488_v15 = vlaneseq }
  0x85   : > { %2662 = vsyncadd (%p3243_p7), [#allocation12], 4294967280  ;;  %v2412_v8 = vld [vmem:[%s3207_s3 + $0x8] sm:$0xff]   ;;  %2202 = vmatprep.subr.bf16.mxu0 %v2691_v9  ;;  %2210 = vmatprep.subr.bf16.mxu1 %v2691_v9  ;;  %v2414_v11 = vld [vmem:[%s3207_s3] sm:$0xff]   ;;  %s2693_s18 = smov 104   ;;  %vm1132_vm2 = vcmask 64512  }
  0x86   : > { %s458_s4 = scalar_select %p457_p9, %s2778_s19, 1  ;;  %2203 = vmatpush3.bf16.msra.mxu0 %v2411_v7  ;;  %2211 = vmatpush3.bf16.msra.mxu1 %v2412_v8  ;;  %v489_v16 = vshrl.u32 %v488_v15, 7  ;;  %v463_v17 = vld [vmem:[%s2916_s7] sm:$0x1]  ;;  %v2117_v23 = vld [vmem:[%s2916_s7 + $0x1] ss:$0 sm:$0xff] }
  0x87   : > { %2204 = vmatprep.subr.bf16.mxu0 %v2691_v9  ;;  %2212 = vmatprep.subr.bf16.mxu1 %v2691_v9  ;;  %v487_v18 = vadd.f32 1.0, %v463_v17  ;;  %v2415_v26 = vld [vmem:[#allocation5 + $0x8] sm:$0xff]   ;;  %v2416_v28 = vld [vmem:[#allocation5] sm:$0xff]   ;;  %s2694_s7 = smov 120   ;;  %v2696_v45 = vmov 1983009808  }
  0x88   : > { %s2116_s8 = sshll.u32 %s458_s4, 3  ;;  %2206 = vmatprep.mubr.msk.bf16.mxu0 %vm2692_vm1, %v2691_v9  ;;  %2214 = vmatprep.mubr.msk.bf16.mxu1 %vm2692_vm1, %v2691_v9  ;;  %v490_v19 = vsub.s32 0, %v489_v16  ;;  %v2122_v29 = vld [vmem:[#allocation8 + $0x1] ss:$0 sm:$0xff]  ;;  %v2118_v37 = vld [vmem:[#allocation8] ss:$0 sm:$0xff]  ;;  %v695_v46 = vunpack.c.l.s4 %v2696_v45 }
  0x89   : > { %s460_s22 = scalar_lea.vmem %s3204_s0, %s2116_s8  ;;  %s2695_s4 = smov 112   ;;  %v2697_v47 = vmov 1934713408   ;;  %vm1372_vm3 = vcmask 1043456   ;;  %vm1703_vm4 = vcmask 130048   ;;  %vm1705_vm5 = vcmask 195584  }
  0x8a   : > { %v2939_v0 = vld [vmem:[%s460_s22] sm:$0xff]  ;;  %2205 = vmatpush3.bf16.msra.mxu0 %v2413_v10  ;;  %2213 = vmatpush3.bf16.msra.mxu1 %v2414_v11  ;;  %v491_v20 = vrot.slane %v487_v18, %v490_v19  ;;  %v727_v48 = vunpack.c.l.s4 %v2697_v47  ;;  %v696_v49 = vunpack.c.0.s8 %v695_v46  ;;  %s2698_s8 = smov 16   ;;  %s2699_s20 = smov 8   ;;  %vm1908_vm6 = vcmask 523264  }
  0x8b   : > { %v473_v1 = vsel %vm472_vm0, %v2939_v0, 0.0  ;;  %2218 = vmatprep.subr.bf16.mxu0 %v2691_v9  ;;  %2226 = vmatprep.subr.bf16.mxu1 %v2691_v9  ;;  %s2700_s11 = smov 24   ;;  %s2115_s6 = sshll.u32 %s2912_s5, 3 }
  0x8c   : > { %474 = vadd.xlane.f32.xlu0 %v473_v1  ;;  %v728_v52 = vunpack.c.0.s8 %v727_v48  ;;  %v2988_v53 = vsub.s32 %v696_v49, %v489_v16  ;;  %p3244_p13 = scmp.ne.s32.totalorder %s3233_s12, 0  ;;  %s2701_s29 = smov [#allocation13]  }
  0x8d   : > { %s2609_s26 = sshll.u32 %s2701_s29, 4  ;;  %s2610_s26 = int_to_ptr.vmem [resolvable:$false] %s2609_s26 }
  0x8e   : > { %v2990_v59 = vsub.s32 %v728_v52, %v489_v16  ;;  %s2611_s24 = scalar_lea.vmem %s2610_s26, 256 }
 0x115   : > { %v475_v2 = vpop.xlane.xlu0 %474 }
 0x116   : > { %v477_v3 = vmul.f32 0.03125, %v475_v2 }
 0x118   : > { %v478_v4 = vsub.f32 %v2939_v0, %v477_v3 }
 0x11a   : > { %v479_v5 = vmul.f32 %v478_v4, %v478_v4 }
 0x11c   : > { %v480_v6 = vsel %vm472_vm0, %v479_v5, 0.0 }
 0x11d   : > { %481 = vadd.xlane.f32.xlu0 %v480_v6 }
 0x1a6   : > { %v482_v12 = vpop.xlane.xlu0 %481 }
 0x1a7   : > { %v483_v13 = vmul.f32 0.03125, %v482_v12 }
 0x1a9   : > { %v484_v14 = vadd.f32 1e-05, %v483_v13 }
 0x1ab   : > { %2425 = vrsqrt.f32 %v484_v14 }
 0x1b8   : > { %v2426_v21 = vpop.eup %2425 }
 0x1b9   : > { %v486_v22 = vmul.f32 %v2426_v21, %v478_v4 }
 0x1bb   : > { %v492_v24 = vmul.f32 %v491_v20, %v486_v22 }
 0x1bd   : > { %v497_v25 = vadd.f32 %v2117_v23, %v492_v24 }
 0x1bf   : > { %v498_v27 = vpack.c.bf16 %v497_v25, %v497_v25 }
 0x1c1   : > { %2207 = vmatmul.mubr.msk.bf16.vlgmr.msra.gmra.mxu0 %vm472_vm0, %v498_v27  ;;  %2215 = vmatmul.mubr.msk.bf16.vlgmr.msra.gmra.mxu1 %vm472_vm0, %v498_v27 }
 0x1c2   : > { %2219 = vmatpush3.bf16.msra.mxu0 %v2415_v26  ;;  %2222 = vmatprep.mubr.msk.bf16.mxu0 %vm2692_vm1, %v2691_v9 }
 0x1c3   : > { %2220 = vmatprep.subr.bf16.mxu0 %v2691_v9  ;;  %2228 = vmatprep.mubr.msk.bf16.mxu1 %vm2692_vm1, %v2691_v9 }
 0x1c6   : > { %2221 = vmatpush3.bf16.msra.mxu0 %v2416_v28 }
 0x1c7   : > { %2232 = vmatprep.subr.bf16.mxu0 %v2691_v9 }
 0x1c9   : > { %2223 = vmatmul.mubr.msk.bf16.vlgmr.msra.gmra.mxu0 %vm472_vm0, %v498_v27 }
 0x1ca   : > { %2234 = vmatprep.mubr.msk.bf16.mxu0 %vm2692_vm1, %v2691_v9 }
 0x281   : > { %v556_v30 = vpop.f32.mrf.mxu0  ;;  %v616_v31 = vpop.f32.mrf.mxu1 }
 0x282   : > { %v617_v32 = vadd.f32 %v2122_v29, %v616_v31  ;;  %v557_v41 = vadd.f32 %v2118_v37, %v556_v30 }
 0x283   : > { %v2208_v33 = vpop.f32.mrf.mxu0  ;;  %v2216_v34 = vpop.f32.mrf.mxu1 }
 0x284   : > { %839 = vrot.lane.b32.xlu0 %v617_v32, %s2693_s18  ;;  %833 = vrot.lane.b32.xlu1 %v617_v32, %s2694_s7 }
 0x285   : > { %v559_v35 = vpop.f32.mrf.mxu0  ;;  %v619_v36 = vpop.f32.mrf.mxu1 }
 0x287   : > { %v2209_v38 = vpop.f32.mrf.mxu0  ;;  %v2217_v39 = vpop.f32.mrf.mxu1 }
 0x288   : > { %836 = vrot.lane.b32.xlu1 %v617_v32, %s2695_s4 }
 0x289   : > { %v2983_v40 = vpop.f32.mrf.mxu0 }
 0x28b   : > { %v2224_v42 = vpop.f32.mrf.mxu0 }
 0x28c   : > { %683 = vrot.lane.b32.xlu1 %v557_v41, %s2694_s7 }
 0x28d   : > { %v679_v43 = vpop.f32.mrf.mxu0 }
 0x28f   : > { %v2225_v44 = vpop.f32.mrf.mxu0 }
 0x290   : > { %686 = vrot.lane.b32.xlu1 %v557_v41, %s2695_s4 }
 0x294   : > { %689 = vrot.lane.b32.xlu1 %v557_v41, %s2693_s18 }
 0x2f6   : > { %v840_v50 = vpop.permute.xlu0 %839  ;;  %v834_v51 = vpop.permute.xlu1 %833 }
 0x2f7   : > { %v858_v54 = vcombine.low %v834_v51, %v840_v50  ;;  %v859_v55 = vcombine.high %v834_v51, %v840_v50 }
 0x2f9   : > { %v866_v60 = vrot.slane %v858_v54, %v2988_v53  ;;  %v873_v61 = vrot.slane %v859_v55, %v2988_v53 }
 0x2fa   : > { %v837_v56 = vpop.permute.xlu1 %836 }
 0x2fb   : > { %v842_v57 = vcombine.low %v617_v32, %v837_v56  ;;  %v843_v58 = vcombine.high %v617_v32, %v837_v56 }
 0x2fd   : > { %v850_v62 = vrot.slane %v842_v57, %v2988_v53  ;;  %v857_v63 = vrot.slane %v843_v58, %v2988_v53 }
 0x2fe   : > { %v684_v1 = vpop.permute.xlu1 %683 }
 0x2ff   : > { %v874_v2 = vcombine.low %v850_v62, %v866_v60  ;;  %v875_v3 = vcombine.high %v850_v62, %v866_v60  ;;  %v890_v4 = vcombine.low %v857_v63, %v873_v61  ;;  %v891_v5 = vcombine.high %v857_v63, %v873_v61 }
 0x301   : > { %v882_v6 = vrot.slane %v874_v2, %v2990_v59  ;;  %v889_v7 = vrot.slane %v875_v3, %v2990_v59  ;;  %v898_v8 = vrot.slane %v890_v4, %v2990_v59  ;;  %v905_v10 = vrot.slane %v891_v5, %v2990_v59 }
 0x302   : > { %v687_v11 = vpop.permute.xlu1 %686 }
 0x303   : > { %v910_v12 = vcombine.low %v882_v6, %v889_v7  ;;  %v2132_v13 = vcombine.high %v882_v6, %v889_v7  ;;  %v926_v14 = vcombine.low %v898_v8, %v905_v10  ;;  %v2133_v15 = vcombine.high %v898_v8, %v905_v10 }
 0x304   : > { %v692_v16 = vcombine.low %v557_v41, %v687_v11  ;;  %v693_v17 = vcombine.high %v557_v41, %v687_v11 }
 0x305   : > { %v917_v18 = vrot.slane %v910_v12, %v2988_v53  ;;  %v925_v19 = vrot.slane %v2132_v13, %v2988_v53  ;;  %v933_v20 = vrot.slane %v926_v14, %v2988_v53  ;;  %v941_v21 = vrot.slane %v2133_v15, %v2988_v53 }
 0x306   : > { %v690_v22 = vpop.permute.xlu1 %689  ;;  %v700_v27 = vrot.slane %v692_v16, %v2988_v53  ;;  %v707_v28 = vrot.slane %v693_v17, %v2988_v53 }
 0x307   : > { %v708_v23 = vcombine.low %v684_v1, %v690_v22  ;;  %v709_v24 = vcombine.high %v684_v1, %v690_v22  ;;  %v942_v25 = vcombine.low %v917_v18, %v925_v19  ;;  %v958_v26 = vcombine.low %v933_v20, %v941_v21 }
 0x308   : > { %v943_v33 = vcombine.high %v917_v18, %v925_v19  ;;  %v959_v34 = vcombine.high %v933_v20, %v941_v21 }
 0x309   : > { %v716_v29 = vrot.slane %v708_v23, %v2988_v53  ;;  %v723_v30 = vrot.slane %v709_v24, %v2988_v53  ;;  %v950_v31 = vrot.slane %v942_v25, %v2990_v59  ;;  %v966_v32 = vrot.slane %v958_v26, %v2990_v59 }
 0x30a   : > { %v957_v48 = vrot.slane %v943_v33, %v2990_v59  ;;  %v973_v49 = vrot.slane %v959_v34, %v2990_v59 }
 0x30b   : > { %v724_v35 = vcombine.low %v700_v27, %v716_v29  ;;  %v725_v36 = vcombine.high %v700_v27, %v716_v29  ;;  %v740_v37 = vcombine.low %v707_v28, %v723_v30  ;;  %v741_v38 = vcombine.high %v707_v28, %v723_v30 }
 0x30c   : > { %v974_v39 = vcombine.low %v950_v31, %v966_v32  ;;  %v975_v41 = vcombine.high %v950_v31, %v966_v32  ;;  %v976_v1 = vcombine.low %v957_v48, %v973_v49  ;;  %v977_v2 = vcombine.high %v957_v48, %v973_v49 }
 0x30d   : > { %v732_v42 = vrot.slane %v724_v35, %v2990_v59  ;;  %v739_v43 = vrot.slane %v725_v36, %v2990_v59  ;;  %v748_v44 = vrot.slane %v740_v37, %v2990_v59  ;;  %v755_v45 = vrot.slane %v741_v38, %v2990_v59 }
 0x30e   : > { %v978_v46 = vpack.c.bf16 %v974_v39, %v974_v39  ;;  %v979_v47 = vpack.c.bf16 %v975_v41, %v975_v41  ;;  %v980_v10 = vpack.c.bf16 %v976_v1, %v976_v1  ;;  %v981_v11 = vpack.c.bf16 %v977_v2, %v977_v2 }
 0x30f   : > { %v760_v50 = vcombine.low %v732_v42, %v739_v43  ;;  %v2130_v51 = vcombine.high %v732_v42, %v739_v43  ;;  %v776_v52 = vcombine.low %v748_v44, %v755_v45  ;;  %v2131_v54 = vcombine.high %v748_v44, %v755_v45 }
 0x310   : > { %v1137_v55 = vsel %vm1132_vm2, %v978_v46, 0  ;;  %v1183_v56 = vsel %vm1132_vm2, %v979_v47, 0  ;;  %v1229_v16 = vsel %vm1132_vm2, %v980_v10, 0  ;;  %v1275_v17 = vsel %vm1132_vm2, %v981_v11, 0  ;;  %v2126_v47 = vld [vmem:[#allocation8 + $0x2] ss:$0 sm:$0xff] }
 0x311   : > { %v767_v57 = vrot.slane %v760_v50, %v2988_v53  ;;  %v775_v58 = vrot.slane %v2130_v51, %v2988_v53  ;;  %v783_v60 = vrot.slane %v776_v52, %v2988_v53  ;;  %v791_v61 = vrot.slane %v2131_v54, %v2988_v53  ;;  %2227 = vmatpush3.bf16.xpose.msra.mxu1 %v1137_v55 }
 0x312   : > { %2233 = vmatpush3.bf16.xpose.msra.mxu0 %v1183_v56  ;;  %2238 = vmatprep.subr.bf16.mxu1 %v2691_v9  ;;  %v677_v48 = vadd.f32 %v2126_v47, %v2983_v40 }
 0x313   : > { %v792_v62 = vcombine.low %v767_v57, %v775_v58  ;;  %v808_v63 = vcombine.low %v783_v60, %v791_v61  ;;  %2244 = vmatprep.subr.bf16.mxu0 %v2691_v9  ;;  %v793_v3 = vcombine.high %v767_v57, %v775_v58  ;;  %v809_v4 = vcombine.high %v783_v60, %v791_v61 }
 0x315   : > { %v800_v5 = vrot.slane %v792_v62, %v2990_v59  ;;  %v816_v6 = vrot.slane %v808_v63, %v2990_v59  ;;  %v807_v14 = vrot.slane %v793_v3, %v2990_v59  ;;  %v823_v15 = vrot.slane %v809_v4, %v2990_v59 }
 0x317   : > { %v824_v7 = vcombine.low %v800_v5, %v816_v6  ;;  %v825_v8 = vcombine.high %v800_v5, %v816_v6  ;;  %v826_v18 = vcombine.low %v807_v14, %v823_v15  ;;  %v827_v19 = vcombine.high %v807_v14, %v823_v15 }
 0x319   : > { %v828_v12 = vpack.c.bf16 %v824_v7, %v824_v7  ;;  %v829_v13 = vpack.c.bf16 %v825_v8, %v825_v8  ;;  %v830_v20 = vpack.c.bf16 %v826_v18, %v826_v18  ;;  %v831_v21 = vpack.c.bf16 %v827_v19, %v827_v19 }
 0x31b   : > { %2229 = vmatmul.mubr.msk.bf16.vlgmr.msra.gmra.mxu1 %vm1132_vm2, %v828_v12  ;;  %2235 = vmatmul.mubr.msk.bf16.vlgmr.msra.gmra.mxu0 %vm1132_vm2, %v829_v13 }
 0x31c   : > { %2239 = vmatpush3.bf16.xpose.msra.mxu1 %v1229_v16  ;;  %2245 = vmatpush3.bf16.xpose.msra.mxu0 %v1275_v17 }
 0x31d   : > { %2240 = vmatprep.mubr.msk.bf16.mxu1 %vm2692_vm1, %v2691_v9  ;;  %2246 = vmatprep.mubr.msk.bf16.mxu0 %vm2692_vm1, %v2691_v9 }
 0x31e   : > { %2250 = vmatprep.subr.bf16.mxu1 %v2691_v9  ;;  %2256 = vmatprep.subr.bf16.mxu0 %v2691_v9 }
 0x323   : > { %2241 = vmatmul.mubr.msk.bf16.vlgmr.msra.gmra.mxu1 %vm1132_vm2, %v830_v20  ;;  %2247 = vmatmul.mubr.msk.bf16.vlgmr.msra.gmra.mxu0 %vm1132_vm2, %v831_v21 }
 0x324   : > { %2252 = vmatprep.mubr.msk.bf16.mxu1 %vm2692_vm1, %v2691_v9  ;;  %2258 = vmatprep.mubr.msk.bf16.mxu0 %vm2692_vm1, %v2691_v9 }
 0x3db   : > { %v1173_v22 = vpop.f32.mrf.mxu1  ;;  %v1219_v23 = vpop.f32.mrf.mxu0 }
 0x3dc   : > { %v1317_v24 = vmul.f32 0.35355338, %v1173_v22  ;;  %v1318_v25 = vmul.f32 0.35355338, %v1219_v23 }
 0x3dd   : > { %v2230_v26 = vpop.f32.mrf.mxu1  ;;  %v2236_v27 = vpop.f32.mrf.mxu0 }
 0x3de   : > { %v1321_v28 = vsel %vm1132_vm2, %v1317_v24, -inf  ;;  %v1324_v29 = vsel %vm1132_vm2, %v1318_v25, -inf }
 0x3df   : > { %1322 = vmax.xlane.f32.xlu1 %v1321_v28  ;;  %v1176_v30 = vpop.f32.mrf.mxu1  ;;  %1325 = vmax.xlane.f32.xlu0 %v1324_v29  ;;  %v1222_v31 = vpop.f32.mrf.mxu0 }
 0x3e1   : > { %v2231_v32 = vpop.f32.mrf.mxu1  ;;  %v2237_v33 = vpop.f32.mrf.mxu0 }
 0x3e3   : > { %v1265_v34 = vpop.f32.mrf.mxu1  ;;  %v1311_v35 = vpop.f32.mrf.mxu0 }
 0x3e4   : > { %v1319_v36 = vmul.f32 0.35355338, %v1265_v34  ;;  %v1320_v39 = vmul.f32 0.35355338, %v1311_v35 }
 0x3e5   : > { %v2242_v37 = vpop.f32.mrf.mxu1  ;;  %v2248_v38 = vpop.f32.mrf.mxu0 }
 0x3e6   : > { %v1327_v41 = vsel %vm1132_vm2, %v1319_v36, -inf  ;;  %v1330_v46 = vsel %vm1132_vm2, %v1320_v39, -inf }
 0x3e7   : > { %1328 = vmax.xlane.f32.xlu1 %v1327_v41  ;;  %v1268_v42 = vpop.f32.mrf.mxu1  ;;  %v1314_v43 = vpop.f32.mrf.mxu0 }
 0x3e9   : > { %v2243_v44 = vpop.f32.mrf.mxu1  ;;  %v2249_v45 = vpop.f32.mrf.mxu0 }
 0x3eb   : > { %1331 = vmax.xlane.f32.xlu1 %v1330_v46 }
 0x3fc   : > { %986 = vrot.lane.b32.xlu1 %v677_v48, %s2695_s4 }
 0x468   : > { %v1323_v49 = vpop.xlane.xlu1 %1322  ;;  %v1326_v50 = vpop.xlane.xlu0 %1325 }
 0x469   : > { %v1333_v51 = vsub.f32 %v1317_v24, %v1323_v49  ;;  %v1334_v52 = vsub.f32 %v1318_v25, %v1326_v50 }
 0x46b   : > { %v1337_v54 = vmul.f32 1.442695, %v1333_v51  ;;  %v1339_v55 = vmul.f32 1.442695, %v1334_v52 }
 0x46d   : > { %2427 = vpow2.f32 %v1337_v54 }
 0x46e   : > { %2429 = vpow2.f32 %v1339_v55 }
 0x470   : > { %v1329_v60 = vpop.xlane.xlu1 %1328 }
 0x471   : > { %v1335_v62 = vsub.f32 %v1319_v36, %v1329_v60 }
 0x473   : > { %v1341_v1 = vmul.f32 1.442695, %v1335_v62 }
 0x474   : > { %v1332_v61 = vpop.xlane.xlu1 %1331 }
 0x475   : > { %v1336_v63 = vsub.f32 %v1320_v39, %v1332_v61  ;;  %2431 = vpow2.f32 %v1341_v1 }
 0x477   : > { %v1343_v2 = vmul.f32 1.442695, %v1336_v63 }
 0x478   : > { %v987_v7 = vpop.permute.xlu1 %986 }
 0x479   : > { %2433 = vpow2.f32 %v1343_v2  ;;  %v992_v11 = vcombine.low %v677_v48, %v987_v7  ;;  %v993_v12 = vcombine.high %v677_v48, %v987_v7 }
 0x47a   : > { %v3050_v56 = vpop.eup %2427 }
 0x47b   : > { %v3052_v57 = vpop.eup %2429  ;;  %v1345_v58 = vsel %vm1132_vm2, %v3050_v56, 0.0  ;;  %v1000_v17 = vrot.slane %v992_v11, %v2988_v53  ;;  %v1007_v18 = vrot.slane %v993_v12, %v2988_v53 }
 0x47c   : > { %1346 = vadd.xlane.f32.xlu0 %v1345_v58  ;;  %v1348_v40 = vsel %vm1132_vm2, %v3052_v57, 0.0 }
 0x47d   : > { %1349 = vadd.xlane.f32.xlu1 %v1348_v40 }
 0x482   : > { %v3060_v3 = vpop.eup %2431 }
 0x483   : > { %v1351_v5 = vsel %vm1132_vm2, %v3060_v3, 0.0 }
 0x486   : > { %v3062_v4 = vpop.eup %2433 }
 0x487   : > { %v1354_v6 = vsel %vm1132_vm2, %v3062_v4, 0.0 }
 0x48e   : > { %989 = vrot.lane.b32.xlu1 %v677_v48, %s2693_s18  ;;  %s2163_s18 = sshll.u32 %s2778_s19, 7  ;;  %s1955_s19 = scalar_lea.sflag [#allocation4], %s2912_s5 }
 0x492   : > { %983 = vrot.lane.b32.xlu0 %v677_v48, %s2694_s7  ;;  %s456_s7 = scalar_lea.vmem [#allocation13], %s2115_s6 }
 0x493   : > { %s1968_s4 = sshll.u32 %s456_s7, 4  ;;  %s3162_s4 = int_to_ptr.vmem [resolvable:$true] %s1968_s4 }
 0x494   : > { %s2605_s22 = scalar_lea.vmem %s3162_s4, 128  ;;  %p2612_p8 = scmp.lt.s32.totalorder %s3162_s4, %s2610_s26 }
 0x495   : > { %p2606_p11 = scmp.ne.s32.totalorder %s3162_s4, %s2605_s22  ;;  %p2613_p10 = scmp.lt.s32.totalorder %s2611_s24, %s2605_s22 }
 0x497   : > { %p2607_p0 = pnand %p2606_p11, %p3244_p13  ;;  %p2614_p1 = por %p2613_p10, %p2612_p8 }
 0x499   : > { %p2608_p5 = pneg %p2607_p0 }
 0x49b   : > { %p2615_p3 = pnand %p2614_p1, %p2608_p5 }
 0x4b1   : > { %1352 = vadd.xlane.f32.xlu0 %v1351_v5 }
 0x4b2   : > { %1355 = vadd.xlane.f32.xlu1 %v1354_v6 }
 0x505   : > { %v1347_v8 = vpop.xlane.xlu0 %1346 }
 0x506   : > { %v1350_v10 = vpop.xlane.xlu1 %1349  ;;  %2435 = vrcp.f32 %v1347_v8 }
 0x507   : > { %2437 = vrcp.f32 %v1350_v10 }
 0x509   : > { %v984_v13 = vpop.permute.xlu0 %983 }
 0x50a   : > { %v990_v14 = vpop.permute.xlu1 %989 }
 0x50b   : > { %v1008_v15 = vcombine.low %v984_v13, %v990_v14  ;;  %v1009_v16 = vcombine.high %v984_v13, %v990_v14  ;;  %v2417_v13 = vld [vmem:[#allocation7 + $0x8] sm:$0xff]  }
 0x50d   : > { %v1016_v19 = vrot.slane %v1008_v15, %v2988_v53  ;;  %v1023_v20 = vrot.slane %v1009_v16, %v2988_v53 }
 0x50f   : > { %v1024_v21 = vcombine.low %v1000_v17, %v1016_v19  ;;  %v1025_v22 = vcombine.high %v1000_v17, %v1016_v19  ;;  %v1040_v23 = vcombine.low %v1007_v18, %v1023_v20  ;;  %v1041_v24 = vcombine.high %v1007_v18, %v1023_v20 }
 0x511   : > { %v1032_v25 = vrot.slane %v1024_v21, %v2990_v59  ;;  %v1039_v26 = vrot.slane %v1025_v22, %v2990_v59  ;;  %v1048_v27 = vrot.slane %v1040_v23, %v2990_v59  ;;  %v1055_v28 = vrot.slane %v1041_v24, %v2990_v59 }
 0x513   : > { %v1060_v29 = vcombine.low %v1032_v25, %v1039_v26  ;;  %v2134_v30 = vcombine.high %v1032_v25, %v1039_v26  ;;  %v1076_v31 = vcombine.low %v1048_v27, %v1055_v28  ;;  %v2135_v32 = vcombine.high %v1048_v27, %v1055_v28  ;;  %v2436_v42 = vpop.eup %2435 }
 0x514   : > { %v2438_v47 = vpop.eup %2437  ;;  %v1361_v55 = vmul.f32 %v2436_v42, %v3050_v56 }
 0x515   : > { %v1067_v33 = vrot.slane %v1060_v29, %v2988_v53  ;;  %v1075_v34 = vrot.slane %v2134_v30, %v2988_v53  ;;  %v1083_v35 = vrot.slane %v1076_v31, %v2988_v53  ;;  %v1091_v36 = vrot.slane %v2135_v32, %v2988_v53 }
 0x516   : > { %v1362_v58 = vmul.f32 %v2438_v47, %v3052_v57  ;;  %v1365_v63 = vpack.c.bf16 %v1361_v55, %v1361_v55 }
 0x517   : > { %v1092_v37 = vcombine.low %v1067_v33, %v1075_v34  ;;  %v1108_v38 = vcombine.low %v1083_v35, %v1091_v36  ;;  %v1093_v39 = vcombine.high %v1067_v33, %v1075_v34  ;;  %v1109_v41 = vcombine.high %v1083_v35, %v1091_v36 }
 0x518   : > { %v1366_v1 = vpack.c.bf16 %v1362_v58, %v1362_v58 }
 0x519   : > { %v1100_v43 = vrot.slane %v1092_v37, %v2990_v59  ;;  %v1116_v44 = vrot.slane %v1108_v38, %v2990_v59  ;;  %v1107_v45 = vrot.slane %v1093_v39, %v2990_v59  ;;  %v1123_v46 = vrot.slane %v1109_v41, %v2990_v59  ;;  %v2418_v41 = vld [vmem:[#allocation7] sm:$0xff]  }
 0x51b   : > { %v1124_v48 = vcombine.low %v1100_v43, %v1116_v44  ;;  %v1125_v49 = vcombine.high %v1100_v43, %v1116_v44  ;;  %v1126_v50 = vcombine.low %v1107_v45, %v1123_v46  ;;  %v1127_v51 = vcombine.high %v1107_v45, %v1123_v46 }
 0x51d   : > { %v1128_v52 = vpack.c.bf16 %v1124_v48, %v1124_v48  ;;  %v1129_v54 = vpack.c.bf16 %v1125_v49, %v1125_v49  ;;  %v1130_v61 = vpack.c.bf16 %v1126_v50, %v1126_v50  ;;  %v1131_v62 = vpack.c.bf16 %v1127_v51, %v1127_v51 }
 0x51f   : > { %v1374_v40 = vsel %vm1372_vm3, %v1128_v52, 0  ;;  %v1420_v60 = vsel %vm1372_vm3, %v1129_v54, 0  ;;  %v1466_v56 = vsel %vm1372_vm3, %v1130_v61, 0  ;;  %v1512_v57 = vsel %vm1372_vm3, %v1131_v62, 0 }
 0x520   : > { %2251 = vmatpush3.bf16.msra.mxu1 %v1374_v40  ;;  %2257 = vmatpush3.bf16.msra.mxu0 %v1420_v60 }
 0x521   : > { %2262 = vmatprep.subr.bf16.mxu1 %v2691_v9  ;;  %2268 = vmatprep.subr.bf16.mxu0 %v2691_v9 }
 0x523   : > { %2253 = vmatmul.mubr.msk.bf16.vlgmr.msra.gmra.mxu1 %vm1132_vm2, %v1365_v63  ;;  %2259 = vmatmul.mubr.msk.bf16.vlgmr.msra.gmra.mxu0 %vm1132_vm2, %v1366_v1 }
 0x524   : > { %2263 = vmatpush3.bf16.msra.mxu1 %v1466_v56  ;;  %2269 = vmatpush3.bf16.msra.mxu0 %v1512_v57 }
 0x525   : > { %2264 = vmatprep.mubr.msk.bf16.mxu1 %vm2692_vm1, %v2691_v9  ;;  %2270 = vmatprep.mubr.msk.bf16.mxu0 %vm2692_vm1, %v2691_v9 }
 0x526   : > { %2274 = vmatprep.subr.bf16.mxu1 %v2691_v9  ;;  %2282 = vmatprep.subr.bf16.mxu0 %v2691_v9 }
 0x53a   : > { %v1353_v2 = vpop.xlane.xlu0 %1352 }
 0x53b   : > { %2439 = vrcp.f32 %v1353_v2  ;;  %v1356_v5 = vpop.xlane.xlu1 %1355 }
 0x53c   : > { %2441 = vrcp.f32 %v1356_v5 }
 0x548   : > { %v2440_v6 = vpop.eup %2439 }
 0x549   : > { %v2442_v7 = vpop.eup %2441  ;;  %v1363_v8 = vmul.f32 %v2440_v6, %v3060_v3 }
 0x54a   : > { %v1364_v10 = vmul.f32 %v2442_v7, %v3062_v4 }
 0x54b   : > { %v1367_v11 = vpack.c.bf16 %v1363_v8, %v1363_v8 }
 0x54c   : > { %v1368_v12 = vpack.c.bf16 %v1364_v10, %v1364_v10 }
 0x54d   : > { %2265 = vmatmul.mubr.msk.bf16.vlgmr.msra.gmra.mxu1 %vm1132_vm2, %v1367_v11 }
 0x54e   : > { %2271 = vmatmul.mubr.msk.bf16.vlgmr.msra.gmra.mxu0 %vm1132_vm2, %v1368_v12  ;;  %2278 = vmatprep.mubr.msk.bf16.mxu1 %vm2692_vm1, %v2691_v9  ;;  %v2146_v12 = vld [vmem:[#allocation8 + $0x3] ss:$0 sm:$0xff] }
 0x54f   : > { %2286 = vmatprep.mubr.msk.bf16.mxu0 %vm2692_vm1, %v2691_v9  ;;  %2275 = vmatpush3.bf16.msra.mxu1 %v2417_v13 }
 0x550   : > { %2276 = vmatprep.subr.bf16.mxu1 %v2691_v9 }
 0x553   : > { %2277 = vmatpush3.bf16.msra.mxu1 %v2418_v41 }
 0x554   : > { %2290 = vmatprep.subr.bf16.mxu1 %v2691_v9 }
 0x5e3   : > { %v1410_v14 = vpop.f32.mrf.mxu1  ;;  %v1456_v3 = vpop.f32.mrf.mxu0 }
 0x5e5   : > { %v2254_v15 = vpop.f32.mrf.mxu1  ;;  %v2260_v4 = vpop.f32.mrf.mxu0 }
 0x5e7   : > { %v1413_v16 = vpop.f32.mrf.mxu1  ;;  %v1459_v17 = vpop.f32.mrf.mxu0 }
 0x5e9   : > { %v2255_v18 = vpop.f32.mrf.mxu1  ;;  %v2261_v19 = vpop.f32.mrf.mxu0 }
 0x60d   : > { %v1502_v20 = vpop.f32.mrf.mxu1 }
 0x60e   : > { %v1554_v21 = vcombine.low %v1410_v14, %v1502_v20  ;;  %v1555_v22 = vcombine.high %v1410_v14, %v1502_v20  ;;  %v1548_v23 = vpop.f32.mrf.mxu0 }
 0x60f   : > { %v1570_v24 = vcombine.low %v1456_v3, %v1548_v23  ;;  %v1571_v25 = vcombine.high %v1456_v3, %v1548_v23  ;;  %v2266_v26 = vpop.f32.mrf.mxu1  ;;  %v2419_v23 = vld [vmem:[#allocation10 + $0x8] sm:$0xff]  }
 0x610   : > { %v1562_v27 = vrot.slane %v1554_v21, %v2988_v53  ;;  %v1569_v28 = vrot.slane %v1555_v22, %v2988_v53  ;;  %v2272_v29 = vpop.f32.mrf.mxu0  ;;  %2283 = vmatpush3.bf16.msra.mxu0 %v2419_v23 }
 0x611   : > { %v1578_v30 = vrot.slane %v1570_v24, %v2988_v53  ;;  %v1585_v31 = vrot.slane %v1571_v25, %v2988_v53  ;;  %v1505_v32 = vpop.f32.mrf.mxu1  ;;  %v2420_v24 = vld [vmem:[#allocation10] sm:$0xff]   ;;  %2284 = vmatprep.subr.bf16.mxu0 %v2691_v9 }
 0x612   : > { %v1551_v33 = vpop.f32.mrf.mxu0 }
 0x613   : > { %v1586_v34 = vcombine.low %v1562_v27, %v1578_v30  ;;  %v1587_v35 = vcombine.high %v1562_v27, %v1578_v30  ;;  %v1602_v36 = vcombine.low %v1569_v28, %v1585_v31  ;;  %v1603_v37 = vcombine.high %v1569_v28, %v1585_v31  ;;  %v2267_v38 = vpop.f32.mrf.mxu1  ;;  %v2150_v28 = vld [vmem:[#allocation8 + $0x4] ss:$0 sm:$0xff]  ;;  %v2151_v30 = vld [vmem:[#allocation8 + $0x5] ss:$0 sm:$0xff] }
 0x614   : > { %v2273_v39 = vpop.f32.mrf.mxu0  ;;  %2285 = vmatpush3.bf16.msra.mxu0 %v2420_v24  ;;  %v2152_v38 = vld [vmem:[#allocation11] ss:$0 sm:$0xff] }
 0x615   : > { %v1594_v42 = vrot.slane %v1586_v34, %v2990_v59  ;;  %v1601_v43 = vrot.slane %v1587_v35, %v2990_v59  ;;  %v1610_v44 = vrot.slane %v1602_v36, %v2990_v59  ;;  %v1617_v45 = vrot.slane %v1603_v37, %v2990_v59  ;;  %v2421_v34 = vld [vmem:[%s3213_s9 + $0x18] sm:$0xff]   ;;  %v2422_v35 = vld [vmem:[%s3213_s9 + $0x10] sm:$0xff]   ;;  %v2423_v36 = vld [vmem:[%s3213_s9 + $0x8] sm:$0xff]  }
 0x616   : > { %v2424_v37 = vld [vmem:[%s3213_s9] sm:$0xff]  }
 0x617   : > { %v1622_v46 = vcombine.low %v1594_v42, %v1601_v43  ;;  %v2144_v47 = vcombine.high %v1594_v42, %v1601_v43  ;;  %v1638_v48 = vcombine.low %v1610_v44, %v1617_v45  ;;  %v2145_v49 = vcombine.high %v1610_v44, %v1617_v45 }
 0x619   : > { %v1629_v50 = vrot.slane %v1622_v46, %v2988_v53  ;;  %v1637_v51 = vrot.slane %v2144_v47, %v2988_v53  ;;  %v1645_v52 = vrot.slane %v1638_v48, %v2988_v53  ;;  %v1653_v54 = vrot.slane %v2145_v49, %v2988_v53 }
 0x61b   : > { %v1655_v55 = vcombine.high %v1629_v50, %v1637_v51  ;;  %v1671_v58 = vcombine.high %v1645_v52, %v1653_v54  ;;  %v1654_v40 = vcombine.low %v1629_v50, %v1637_v51  ;;  %v1670_v60 = vcombine.low %v1645_v52, %v1653_v54 }
 0x61d   : > { %v1669_v61 = vrot.slane %v1655_v55, %v2990_v59  ;;  %v1685_v62 = vrot.slane %v1671_v58, %v2990_v59  ;;  %v1662_v63 = vrot.slane %v1654_v40, %v2990_v59  ;;  %v1678_v1 = vrot.slane %v1670_v60, %v2990_v59  ;;  %v2156_v55 = vld [vmem:[#allocation8 + $0x6] ss:$0 sm:$0xff] }
 0x61f   : > { %v1688_v56 = vcombine.low %v1669_v61, %v1685_v62  ;;  %v1687_v57 = vcombine.high %v1662_v63, %v1678_v1  ;;  %v1686_v2 = vcombine.low %v1662_v63, %v1678_v1  ;;  %v1689_v53 = vcombine.high %v1669_v61, %v1685_v62 }
 0x621   : > { %1695 = vrot.lane.b32.xlu1 %v1688_v56, %s2698_s8  ;;  %1691 = vrot.lane.b32.xlu0 %v1687_v57, %s2699_s20 }
 0x625   : > { %1699 = vrot.lane.b32.xlu0 %v1689_v53, %s2700_s11  ;;  %s3160_s11 = scalar_lea.hbm %s3214_s10, %s2163_s18 }
 0x693   : > { %v1692_v5 = vpop.permute.xlu0 %1691  ;;  %v1696_v6 = vpop.permute.xlu1 %1695 }
 0x694   : > { %v1702_v7 = vsel %vm1132_vm2, %v1686_v2, %v1692_v5 }
 0x695   : > { %v1704_v10 = vsel %vm1703_vm4, %v1702_v7, %v1696_v6 }
 0x697   : > { %v1700_v8 = vpop.permute.xlu0 %1699 }
 0x698   : > { %v1706_v11 = vsel %vm1705_vm5, %v1704_v10, %v1700_v8 }
 0x699   : > { %v1707_v59 = vpack.c.bf16 %v1706_v11, %v1706_v11 }
 0x69b   : > { %2279 = vmatmul.mubr.msk.bf16.vlgmr.msra.gmra.mxu1 %vm472_vm0, %v1707_v59 }
 0x69c   : > { %2298 = vmatprep.mubr.msk.bf16.mxu1 %vm2692_vm1, %v2691_v9  ;;  %2291 = vmatpush3.bf16.msra.mxu1 %v2421_v34 }
 0x69d   : > { %2292 = vmatprep.subr.bf16.mxu1 %v2691_v9 }
 0x6a0   : > { %2293 = vmatpush3.bf16.msra.mxu1 %v2422_v35 }
 0x6a1   : > { %2294 = vmatprep.subr.bf16.mxu1 %v2691_v9 }
 0x6a4   : > { %2295 = vmatpush3.bf16.msra.mxu1 %v2423_v36 }
 0x6a5   : > { %2296 = vmatprep.subr.bf16.mxu1 %v2691_v9 }
 0x6a8   : > { %2297 = vmatpush3.bf16.msra.mxu1 %v2424_v37 }
 0x75b   : > { %v1765_v13 = vpop.f32.mrf.mxu1 }
 0x75c   : > { %v1766_v14 = vadd.f32 %v2146_v12, %v1765_v13 }
 0x75d   : > { %v2280_v3 = vpop.f32.mrf.mxu1 }
 0x75e   : > { %v3131_v15 = vadd.f32 %v1766_v14, %v2939_v0 }
 0x75f   : > { %v1768_v4 = vpop.f32.mrf.mxu1 }
 0x760   : > { %v1772_v16 = vsel %vm472_vm0, %v3131_v15, 0.0 }
 0x761   : > { %1773 = vadd.xlane.f32.xlu1 %v1772_v16  ;;  %v2281_v17 = vpop.f32.mrf.mxu1 }
 0x7ea   : > { %v1774_v18 = vpop.xlane.xlu1 %1773 }
 0x7eb   : > { %v1775_v19 = vmul.f32 0.03125, %v1774_v18 }
 0x7ed   : > { %v1776_v20 = vsub.f32 %v3131_v15, %v1775_v19 }
 0x7ef   : > { %v1777_v21 = vmul.f32 %v1776_v20, %v1776_v20 }
 0x7f1   : > { %v1778_v22 = vsel %vm472_vm0, %v1777_v21, 0.0 }
 0x7f2   : > { %1779 = vadd.xlane.f32.xlu0 %v1778_v22 }
 0x87b   : > { %v1780_v0 = vpop.xlane.xlu0 %1779 }
 0x87c   : > { %v1781_v25 = vmul.f32 0.03125, %v1780_v0 }
 0x87e   : > { %v1782_v26 = vadd.f32 1e-05, %v1781_v25 }
 0x880   : > { %2443 = vrsqrt.f32 %v1782_v26 }
 0x88d   : > { %v2444_v27 = vpop.eup %2443 }
 0x88e   : > { %v1784_v29 = vmul.f32 %v2444_v27, %v1776_v20 }
 0x890   : > { %v1789_v31 = vmul.f32 %v2150_v28, %v1784_v29 }
 0x892   : > { %v1794_v32 = vadd.f32 %v2151_v30, %v1789_v31 }
 0x894   : > { %v1795_v33 = vpack.c.bf16 %v1794_v32, %v1794_v32 }
 0x896   : > { %2287 = vmatmul.mubr.msk.bf16.vlgmr.msra.gmra.mxu0 %vm472_vm0, %v1795_v33 }
 0x956   : > { %v1856_v39 = vpop.f32.mrf.mxu0 }
 0x957   : > { %v1857_v41 = vadd.f32 %v2152_v38, %v1856_v39 }
 0x958   : > { %v2288_v42 = vpop.f32.mrf.mxu0 }
 0x959   : > { %v1863_v43 = vmul.f32 0.044715, %v1857_v41  ;;  %v1862_v51 = vmul.f32 0.5, %v1857_v41 }
 0x95a   : > { %v1859_v44 = vpop.f32.mrf.mxu0 }
 0x95b   : > { %v1864_v45 = vmul.f32 %v1863_v43, %v1857_v41 }
 0x95c   : > { %v2289_v46 = vpop.f32.mrf.mxu0 }
 0x95d   : > { %v1865_v47 = vmul.f32 %v1864_v45, %v1857_v41 }
 0x95f   : > { %v1866_v48 = vadd.f32 %v1865_v47, %v1857_v41 }
 0x961   : > { %v1867_v49 = vmul.f32 0.7978846, %v1866_v48 }
 0x963   : > { %2445 = vtanh.f32 %v1867_v49 }
 0x970   : > { %v2446_v50 = vpop.eup %2445 }
 0x971   : > { %v1869_v52 = vadd.f32 1.0, %v2446_v50 }
 0x973   : > { %v1870_v54 = vmul.f32 %v1869_v52, %v1862_v51 }
 0x975   : > { %v1871_v9 = vpack.c.bf16 %v1870_v54, %v1870_v54 }
 0x977   : > { %2299 = vmatmul.mubr.msk.bf16.vlgmr.msra.gmra.mxu1 %vm1908_vm6, %v1871_v9 }
 0xa37   : > { %v1946_v58 = vpop.f32.mrf.mxu1 }
 0xa38   : > { %v1947_v40 = vadd.f32 %v2156_v55, %v1946_v58 }
 0xa39   : > { %v2300_v60 = vpop.f32.mrf.mxu1 }
 0xa3a   : > { %v1952_v61 = vadd.f32 %v1947_v40, %v3131_v15 }
 0xa3b   : > { %v1949_v62 = vpop.f32.mrf.mxu1 }
 0xa3c   : > { %1953 = vst.msk [vmem:[%s456_s7] sm:$0xff] %vm472_vm0, %v1952_v61 }
 0xa3d   : > { %v2301_v63 = vpop.f32.mrf.mxu1 }
 0xa3e   : > { %2618 = shalt.err (!%p2615_p3)
}
 0xa3f   : > { %s2619_s27 = scalar_lea.hbm %s3160_s11, 128  ;;  %s2623_s28 = scalar_lea.hbm %s3214_s10, 256 }
 0xa40   : > { %p2620_p4 = scmp.ne.s32.totalorder %s3160_s11, %s2619_s27  ;;  %p2624_p2 = scmp.lt.s32.totalorder %s3160_s11, %s3214_s10 }
 0xa41   : > { %p2625_p7 = scmp.lt.s32.totalorder %s2623_s28, %s2619_s27 }
 0xa42   : > { %p2621_p12 = pnand %p2620_p4, %p3244_p13 }
 0xa43   : > { %p2626_p9 = por %p2625_p7, %p2624_p2 }
 0xa44   : > { %p2622_p6 = pneg %p2621_p12 }
 0xa46   : > { %p2627_p11 = pnand %p2626_p9, %p2622_p6 }
 0xa48   : > { %2630 = shalt.err (!%p2627_p11)
}
 0xa49   : > { %2324 = dma.vmem_to_hbm [thread:$0]  (%p3244_p13), %s3162_s4, 128, %s3160_s11, %s1955_s19  }
 0xa4a PF: > { %s1980_s18 = sand.u32 1, %s2669_s13   ;;  %p3245_p0 = scmp.ne.s32.totalorder %s3234_s25, 0 }
 0xa4b   : > { %p3246_p5 = scmp.ge.s32.totalorder %s2681_s16, 2  ;;  %s1981_s7 = scalar_lea.sflag [#allocation4], %s1980_s18 }
 0xa4d   : > { %p2347_p8 = pnand %p3246_p5, %p3245_p0 }
 0xa4f   : > { %p2348_p10 = pneg %p2347_p8 }
 0xa51   : > { %2664 = dma.done.wait (%p2348_p10), %s1981_s7, 128  }
 0xa52   : > { %2666 = vsyncadd (%p2348_p10), %s1981_s7, 4294967168  ;;  %p26_p1 = scmp.ge.s32.totalorder %s2855_s23, 4   ;;  %s3247_s13 = smov %s2673_s14 }
 0xa53   : > { %s3248_s14 = smov %s2677_s15  ;;  %s3249_s15 = smov %s2867_s30 }
 0xa54   : > { %s3250_s16 = smov %s2855_s23  ;;  %28 = sbr.rel (!%p26_p1) target bundleno = 14 (0xe), region = 128 }
 0xa59   :  { %1986 = vsyncpa [#allocation3], 1 }
 0xa5a   :  { %1988 = vsyncpa [#allocation3 + $0x1], 1 }
 0xa5b   :  { %1989 = vsyncpa [#allocation6], 1 }
 0xa5c   :  { %1990 = vsyncpa [#allocation9], 1 }
 0xa5d   :  { %1991 = vsyncpa [#allocation12], 1 }
 0xa5e   :  { %1992 = vsyncpa [#allocation4], 1 }
 0xa5f   :  { %1994 = vsyncpa [#allocation4 + $0x1], 1 }

// kernel: tpu_custom_call.1
= control target key start
LH: loop header
LB: loop body
LE: loop exit
PB: predicated region body
PF: predicated region fallthrough
CT: control target
= control target key end

     0   :  { %s3204_s0 = inlined_call_operand.vmem [shape: f32[2,8,32], index: 0, kind: input, shape index: {}]   ;;  %s3205_s1 = inlined_call_operand.hbm [shape: f32[2,2,32], index: 1, kind: input, shape index: {}]   ;;  %s3206_s2 = inlined_call_operand.vmem [shape: bf16[32,32], index: 2, kind: input, shape index: {}]   ;;  %s3207_s3 = inlined_call_operand.vmem [shape: bf16[32,32], index: 3, kind: input, shape index: {}]   ;;  %s3208_s4 = inlined_call_operand.hbm [shape: bf16[32,32], index: 4, kind: input, shape index: {}]   ;;  %s3209_s5 = inlined_call_operand.hbm [shape: bf16[32,32], index: 5, kind: input, shape index: {}]   ;;  %s3210_s6 = inlined_call_operand.hbm [shape: f32[8,32], index: 6, kind: input, shape index: {}]   ;;  %s3211_s7 = inlined_call_operand.hbm [shape: bf16[32,64], index: 7, kind: input, shape index: {}]   ;;  %s3212_s8 = inlined_call_operand.hbm [shape: f32[1,64], index: 8, kind: input, shape index: {}]   ;;  %s3213_s9 = inlined_call_operand.vmem [shape: bf16[64,32], index: 9, kind: input, shape index: {}]   ;;  %s3214_s10 = inlined_call_operand.hbm [shape: f32[2,8,32], index: 10, kind: output, shape index: {}]  }
   0x1   :  { %3219 = sst [smem:[#allocation19_spill]] %s3208_s4 }
   0x2   :  { %3220 = sst [smem:[#allocation20_spill]] %s3209_s5 }
   0x3   :  { %3221 = sst [smem:[#allocation21_spill]] %s3210_s6 }
   0x4   :  { %3222 = sst [smem:[#allocation22_spill]] %s3211_s7 }
   0x5   :  { %3223 = sst [smem:[#allocation23_spill]] %s3212_s8 }
   0x6   :  { %15 = vsyncpa [#allocation3], 0 }
   0x7   :  { %17 = vsyncpa [#allocation3 + $0x1], 0 }
   0x8   :  { %18 = vsyncpa [#allocation6], 0 }
   0x9   :  { %19 = vsyncpa [#allocation9], 0 }
   0xa   :  { %20 = vsyncpa [#allocation12], 0 }
   0xb   :  { %21 = vsyncpa [#allocation4], 0 }
   0xc   :  { %23 = vsyncpa [#allocation4 + $0x1], 0  ;;  %s2757_s13 = smov 0   ;;  %s2759_s14 = smov 0  }
   0xd   :  { %s2761_s15 = smov 0   ;;  %s2763_s16 = smov 0  }
   0xe LB: > { %s2683_s17 = smov [#allocation5]   ;;  %s2778_s19 = sadd.s32 4294967295, %s2681_s16   ;;  %s2681_s16 = sphi %s2763_s16, %s3250_s16   ;;  %s2677_s15 = sphi %s2761_s15, %s3249_s15   ;;  %s2673_s14 = sphi %s2759_s14, %s3248_s14   ;;  %s2669_s13 = sphi %s2757_s13, %s3247_s13  }
   0xf   : > { %s298_s18 = sshll.u32 %s2683_s17, 4  ;;  %p2099_p0 = scmp.ge.s32.totalorder %s2681_s16, 1  ;;  %s299_s18 = int_to_ptr.vmem [resolvable:$true] %s298_s18 }
  0x10   : > { %p3215_p1 = scmp.eq.s32.totalorder %s2778_s19, 0  ;;  %p280_p2 = scmp.lt.s32.totalorder %s2681_s16, 3 }
  0x11   : > { %s2684_s21 = smov [#allocation8]   ;;  %s2685_s24 = smov [#allocation7]  }
  0x12   : > { %p2783_p3 = pnand %p2099_p0, %p280_p2  ;;  %s325_s22 = sshll.u32 %s2684_s21, 4  ;;  %s326_s22 = int_to_ptr.vmem [resolvable:$true] %s325_s22 }
  0x13   : > { %s311_s25 = sshll.u32 %s2685_s24, 4  ;;  %s2458_s27 = scalar_lea.vmem %s299_s18, 256  ;;  %s2796_s25 = int_to_ptr.vmem [resolvable:$true] %s311_s25 }
  0x14   : > { %s3224_s20 = scalar_select %p2783_p3, 1, 0 }
  0x15   : > { %p2326_p5 = pneg %p2783_p3  ;;  %p2459_p8 = scmp.ne.s32.totalorder %s299_s18, %s2458_s27 }
  0x16   : > { %p2466_p11 = scmp.lt.s32.totalorder %s299_s18, %s299_s18  ;;  %p2467_p12 = scmp.lt.s32.totalorder %s2458_s27, %s2458_s27 }
  0x17   : > { %p2792_p6 = pnand %p2326_p5, %p3215_p1 }
  0x18   : > { %p2468_p13 = por %p2467_p12, %p2466_p11 }
  0x19   : > { %p2800_p7 = pneg %p2792_p6 }
  0x1b   : > { %p2461_p9 = pnand %p2459_p8, %p2800_p7 }
  0x1d   : > { %p2462_p10 = pneg %p2461_p9 }
  0x1f   : > { %p2469_p0 = pnand %p2468_p13, %p2462_p10 }
  0x21   : > { %2472 = shalt.err (!%p2469_p0)
}
  0x22   : > { %s2686_s28 = smov 64   ;;  %s2687_s29 = smov 4  }
  0x23   : > { %s3227_s4 = sld [smem:[#allocation19_spill]]  ;;  %s2484_s12 = scalar_lea.vmem %s326_s22, 128 }
  0x24   : > { %p2485_p2 = scmp.ne.s32.totalorder %s326_s22, %s2484_s12  ;;  %p2492_p9 = scmp.lt.s32.totalorder %s326_s22, %s326_s22 }
  0x25   : > { %p2493_p10 = scmp.lt.s32.totalorder %s2484_s12, %s2484_s12 }
  0x26   : > { %p2487_p5 = pnand %p2485_p2, %p2800_p7 }
  0x27   : > { %p2494_p11 = por %p2493_p10, %p2492_p9 }
  0x28   : > { %p2488_p8 = pneg %p2487_p5 }
  0x29   : > { %2329 = dma.hbm_to_vmem [thread:$0]  (!%p2792_p6), %s3227_s4, 256, %s299_s18, [#allocation6], %s2686_s28, %s2686_s28, %s2687_s29  }
  0x2a   : > { %p2495_p12 = pnand %p2494_p11, %p2488_p8 }
  0x2c   : > { %2498 = shalt.err (!%p2495_p12)
}
  0x2d   : > { %s3228_s6 = sld [smem:[#allocation21_spill]]  ;;  %s2510_s18 = scalar_lea.vmem %s2796_s25, 256 }
  0x2e   : > { %p2511_p13 = scmp.ne.s32.totalorder %s2796_s25, %s2510_s18  ;;  %p2518_p5 = scmp.lt.s32.totalorder %s2796_s25, %s2796_s25 }
  0x2f   : > { %p2519_p9 = scmp.lt.s32.totalorder %s2510_s18, %s2510_s18 }
  0x30   : > { %p2513_p0 = pnand %p2511_p13, %p2800_p7 }
  0x31   : > { %p2520_p8 = por %p2519_p9, %p2518_p5 }
  0x32   : > { %p2514_p2 = pneg %p2513_p0 }
  0x33   : > { %2335 = dma.hbm_to_vmem [thread:$0]  (!%p2792_p6), %s3228_s6, 128, %s326_s22, [#allocation9]  }
  0x34   : > { %p2521_p10 = pnand %p2520_p8, %p2514_p2 }
  0x36   : > { %2524 = shalt.err (!%p2521_p10)
}
  0x37   : > { %s3229_s5 = sld [smem:[#allocation20_spill]]  ;;  %s2688_s22 = smov [#allocation10]  }
  0x38   : > { %s335_s30 = sshll.u32 %s2688_s22, 4  ;;  %s2689_s11 = smov [#allocation11]   ;;  %s336_s30 = int_to_ptr.vmem [resolvable:$true] %s335_s30 }
  0x39   : > { %s349_s12 = sshll.u32 %s2689_s11, 4  ;;  %s2536_s17 = scalar_lea.vmem %s336_s30, 256  ;;  %s350_s12 = int_to_ptr.vmem [resolvable:$true] %s349_s12 }
  0x3a   : > { %p2537_p11 = scmp.ne.s32.totalorder %s336_s30, %s2536_s17  ;;  %p2544_p0 = scmp.lt.s32.totalorder %s336_s30, %s336_s30 }
  0x3b   : > { %p2545_p2 = scmp.lt.s32.totalorder %s2536_s17, %s2536_s17 }
  0x3c   : > { %p2539_p12 = pnand %p2537_p11, %p2800_p7 }
  0x3d   : > { %2332 = dma.hbm_to_vmem [thread:$0]  (!%p2792_p6), %s3229_s5, 256, %s2796_s25, [#allocation6], %s2686_s28, %s2686_s28, %s2687_s29  }
  0x3e   : > { %p2540_p13 = pneg %p2539_p12  ;;  %p2546_p5 = por %p2545_p2, %p2544_p0 }
  0x40   : > { %p2547_p9 = pnand %p2546_p5, %p2540_p13 }
  0x42   : > { %2550 = shalt.err (!%p2547_p9)
}
  0x43   : > { %s3230_s7 = sld [smem:[#allocation22_spill]]  ;;  %s2562_s18 = scalar_lea.vmem %s350_s12, 16 }
  0x44   : > { %p2563_p8 = scmp.ne.s32.totalorder %s350_s12, %s2562_s18  ;;  %s2569_s24 = scalar_lea.vmem %s350_s12, 32 }
  0x45   : > { %p2570_p12 = scmp.lt.s32.totalorder %s350_s12, %s350_s12  ;;  %p2571_p13 = scmp.lt.s32.totalorder %s2569_s24, %s2562_s18 }
  0x46   : > { %p2565_p10 = pnand %p2563_p8, %p2800_p7 }
  0x47   : > { %p2572_p0 = por %p2571_p13, %p2570_p12 }
  0x48   : > { %p2566_p11 = pneg %p2565_p10 }
  0x49   : > { %2338 = dma.hbm_to_vmem [thread:$0]  (!%p2792_p6), %s3230_s7, 256, %s336_s30, [#allocation9], %s2686_s28, %s2686_s28, %s2687_s29  }
  0x4a   : > { %p2573_p2 = pnand %p2572_p0, %p2566_p11 }
  0x4c   : > { %2576 = shalt.err (!%p2573_p2)
}
  0x4d   : > { %s3231_s8 = sld [smem:[#allocation23_spill]]  ;;  %s2098_s26 = sadd.s32 4294967294, %s2681_s16  }
  0x4e   : > { %s2855_s23 = sadd.s32 1, %s2681_s16   ;;  %s62_s28 = sadd.s32 1, %s2677_s15 }
  0x4f   : > { %s59_s29 = ssub.s32 %s2681_s16, %s2855_s23  ;;  %p69_p7 = scmp.ne.s32.totalorder %s2677_s15, %s2673_s14 }
  0x50   : > { %p60_p5 = scmp.eq.s32.totalorder %s59_s29, 0  ;;  %p70_p9 = scmp.eq.s32.totalorder %s2681_s16, 0 }
  0x51   : > { %p75_p8 = scmp.ne.s32.totalorder %s2673_s14, %s2669_s13  ;;  %p267_p10 = scmp.eq.s32.totalorder %s2778_s19, 1 }
  0x52   : > { %s2867_s30 = scalar_select %p60_p5, %s2677_s15, %s62_s28  }
  0x53   : > { %2341 = dma.hbm_to_vmem [thread:$0]  (!%p2792_p6), %s3231_s8, 16, %s350_s12, [#allocation12]  }
  0x54   : > { %p71_p11 = por %p70_p9, %p69_p7  ;;  %p2871_p12 = por %p3215_p1, %p75_p8 }
  0x55   : > { %p2875_p6 = por %p267_p10, %p69_p7  ;;  %p273_p13 = scmp.eq.s32.totalorder %s2098_s26, 1 }
  0x56   : > { %s3232_s11 = scalar_select %p2871_p12, 1, 0 }
  0x57   : > { %s3233_s12 = scalar_select %p2875_p6, 1, 0 }
  0x58   : > { %p2355_p0 = scmp.lt.s32.totalorder %s2681_s16, 2  ;;  %s370_s17 = sand.u32 1, %s2677_s15  }
  0x59   : > { %p2881_p2 = por %p273_p13, %p75_p8  ;;  %s2106_s21 = sshll.u32 %s370_s17, 1 }
  0x5a   : > { %s2107_s18 = sshll.u32 %s2681_s16, 5  ;;  %s374_s28 = scalar_lea.vmem [#allocation2], %s2106_s21 }
  0x5b   : > { %s3234_s25 = scalar_select %p2881_p2, 1, 0 }
  0x5c   : > { %s2889_s22 = scalar_lea.hbm %s3205_s1, %s2107_s18  ;;  %s381_s29 = sshll.u32 %s374_s28, 4  ;;  %s382_s29 = int_to_ptr.vmem [resolvable:$true] %s381_s29 }
  0x5d   : > { %p2891_p7 = pnand %p2355_p0, %p71_p11  ;;  %s371_s4 = scalar_lea.sflag [#allocation3], %s370_s17 }
  0x5e   : > { %s2577_s5 = scalar_lea.hbm %s2889_s22, 32  ;;  %s2582_s27 = scalar_lea.hbm %s3205_s1, 64 }
  0x5f   : > { %p2578_p5 = scmp.ne.s32.totalorder %s2889_s22, %s2577_s5  ;;  %p2579_p9 = pneg %p2891_p7 }
  0x60   : > { %p2583_p11 = scmp.lt.s32.totalorder %s2889_s22, %s3205_s1  ;;  %p2584_p13 = scmp.lt.s32.totalorder %s2582_s27, %s2577_s5 }
  0x61   : > { %p2580_p8 = pnand %p2579_p9, %p2578_p5 }
  0x62   : > { %p2585_p0 = por %p2584_p13, %p2583_p11 }
  0x63   : > { %p2581_p10 = pneg %p2580_p8 }
  0x65   : > { %p2586_p4 = pnand %p2585_p0, %p2581_p10 }
  0x67   : > { %2589 = shalt.err (!%p2586_p4)
}
  0x68   : > { %s2590_s28 = scalar_lea.vmem %s382_s29, 32  ;;  %s2690_s17 = smov [#allocation2]  }
  0x69   : > { %p2591_p1 = scmp.ne.s32.totalorder %s382_s29, %s2590_s28  ;;  %s2595_s7 = sshll.u32 %s2690_s17, 4  ;;  %s2596_s7 = int_to_ptr.vmem [resolvable:$false] %s2595_s7 }
  0x6a   : > { %s2597_s8 = scalar_lea.vmem %s2596_s7, 64  ;;  %p2598_p5 = scmp.lt.s32.totalorder %s382_s29, %s2596_s7 }
  0x6b   : > { %p2593_p2 = pnand %p2591_p1, %p2579_p9  ;;  %p2599_p8 = scmp.lt.s32.totalorder %s2597_s8, %s2590_s28 }
  0x6d   : > { %p2594_p6 = pneg %p2593_p2  ;;  %p2600_p12 = por %p2599_p8, %p2598_p5 }
  0x6f   : > { %p2601_p3 = pnand %p2600_p12, %p2594_p6 }
  0x71   : > { %2604 = shalt.err (!%p2601_p3)
}
  0x72   : > { %2345 = dma.hbm_to_vmem [thread:$0]  (!%p2891_p7), %s2889_s22, 32, %s382_s29, %s371_s4  }
  0x73   : > { %p3236_p10 = scmp.ne.s32.totalorder %s3224_s20, 0 }
  0x74   : > { %s2912_s5 = sand.u32 (!%p3236_p10), 1, %s2673_s14   ;;  %p3237_p1 = scmp.ne.s32.totalorder (!%p3236_p10), %s3232_s11, 0 }
  0x75   : > { %390 = sbr.rel (%p3236_p10) target bundleno = 2634 (0xa4a), region = 60  ;;  %s2109_s6 = sshll.u32 (!%p3236_p10), %s2912_s5, 1 }
  0x76   : > { %s393_s18 = scalar_lea.sflag (!%p3236_p10), [#allocation3], %s2912_s5  ;;  %s2916_s7 = scalar_lea.vmem (!%p3236_p10), [#allocation2], %s2109_s6 }
  0x7a   : > { %2648 = dma.done.wait (%p3237_p1), %s393_s18, 32  }
  0x7b   : > { %2650 = vsyncadd (%p3237_p1), %s393_s18, 4294967264  ;;  %p3238_p3 = scmp.eq.s32.totalorder %s2778_s19, 0 }
  0x7d   : > { %2652 = dma.done.wait (%p3238_p3), [#allocation6], 512   ;;  %p3239_p4 = pmov %p3238_p3 }
  0x7e   : > { %p3240_p12 = pmov %p3238_p3 }
  0x7f   : > { %2654 = vsyncadd (%p3239_p4), [#allocation6], 4294966784 }
  0x80   : > { %2656 = dma.done.wait (%p3240_p12), [#allocation9], 384   ;;  %p3241_p6 = pmov %p3238_p3 }
  0x81   : > { %p3242_p2 = pmov %p3238_p3 }
  0x82   : > { %2658 = vsyncadd (%p3241_p6), [#allocation9], 4294966912 }
  0x83   : > { %2660 = dma.done.wait (%p3242_p2), [#allocation12], 16   ;;  %p3243_p7 = pmov %p3242_p2 }
  0x84   : > { %p457_p9 = scmp.lt.s32.totalorder %s2778_s19, 1  ;;  %vm472_vm0 = vcmask 261120   ;;  %v2411_v7 = vld [vmem:[%s3206_s2 + $0x8] sm:$0xff]   ;;  %v2691_v9 = vmov 0.0   ;;  %v2413_v10 = vld [vmem:[%s3206_s2] sm:$0xff]   ;;  %vm2692_vm1 = vmmov 0   ;;  %v488_v15 = vlaneseq }
  0x85   : > { %2662 = vsyncadd (%p3243_p7), [#allocation12], 4294967280  ;;  %v2412_v8 = vld [vmem:[%s3207_s3 + $0x8] sm:$0xff]   ;;  %2202 = vmatprep.subr.bf16.mxu0 %v2691_v9  ;;  %2210 = vmatprep.subr.bf16.mxu1 %v2691_v9  ;;  %v2414_v11 = vld [vmem:[%s3207_s3] sm:$0xff]   ;;  %s2693_s18 = smov 104   ;;  %vm1132_vm2 = vcmask 64512  }
  0x86   : > { %s458_s4 = scalar_select %p457_p9, %s2778_s19, 1  ;;  %2203 = vmatpush3.bf16.msra.mxu0 %v2411_v7  ;;  %2211 = vmatpush3.bf16.msra.mxu1 %v2412_v8  ;;  %v489_v16 = vshrl.u32 %v488_v15, 7  ;;  %v463_v17 = vld [vmem:[%s2916_s7] sm:$0x1]  ;;  %v2117_v23 = vld [vmem:[%s2916_s7 + $0x1] ss:$0 sm:$0xff] }
  0x87   : > { %2204 = vmatprep.subr.bf16.mxu0 %v2691_v9  ;;  %2212 = vmatprep.subr.bf16.mxu1 %v2691_v9  ;;  %v487_v18 = vadd.f32 1.0, %v463_v17  ;;  %v2415_v26 = vld [vmem:[#allocation5 + $0x8] sm:$0xff]   ;;  %v2416_v28 = vld [vmem:[#allocation5] sm:$0xff]   ;;  %s2694_s7 = smov 120   ;;  %v2696_v45 = vmov 1983009808  }
  0x88   : > { %s2116_s8 = sshll.u32 %s458_s4, 3  ;;  %2206 = vmatprep.mubr.msk.bf16.mxu0 %vm2692_vm1, %v2691_v9  ;;  %2214 = vmatprep.mubr.msk.bf16.mxu1 %vm2692_vm1, %v2691_v9  ;;  %v490_v19 = vsub.s32 0, %v489_v16  ;;  %v2122_v29 = vld [vmem:[#allocation8 + $0x1] ss:$0 sm:$0xff]  ;;  %v2118_v37 = vld [vmem:[#allocation8] ss:$0 sm:$0xff]  ;;  %v695_v46 = vunpack.c.l.s4 %v2696_v45 }
  0x89   : > { %s460_s22 = scalar_lea.vmem %s3204_s0, %s2116_s8  ;;  %s2695_s4 = smov 112   ;;  %v2697_v47 = vmov 1934713408   ;;  %vm1372_vm3 = vcmask 1043456   ;;  %vm1703_vm4 = vcmask 130048   ;;  %vm1705_vm5 = vcmask 195584  }
  0x8a   : > { %v2939_v0 = vld [vmem:[%s460_s22] sm:$0xff]  ;;  %2205 = vmatpush3.bf16.msra.mxu0 %v2413_v10  ;;  %2213 = vmatpush3.bf16.msra.mxu1 %v2414_v11  ;;  %v491_v20 = vrot.slane %v487_v18, %v490_v19  ;;  %v727_v48 = vunpack.c.l.s4 %v2697_v47  ;;  %v696_v49 = vunpack.c.0.s8 %v695_v46  ;;  %s2698_s8 = smov 16   ;;  %s2699_s20 = smov 8   ;;  %vm1908_vm6 = vcmask 523264  }
  0x8b   : > { %v473_v1 = vsel %vm472_vm0, %v2939_v0, 0.0  ;;  %2218 = vmatprep.subr.bf16.mxu0 %v2691_v9  ;;  %2226 = vmatprep.subr.bf16.mxu1 %v2691_v9  ;;  %s2700_s11 = smov 24   ;;  %s2115_s6 = sshll.u32 %s2912_s5, 3 }
  0x8c   : > { %474 = vadd.xlane.f32.xlu0 %v473_v1  ;;  %v728_v52 = vunpack.c.0.s8 %v727_v48  ;;  %v2988_v53 = vsub.s32 %v696_v49, %v489_v16  ;;  %p3244_p13 = scmp.ne.s32.totalorder %s3233_s12, 0  ;;  %s2701_s29 = smov [#allocation13]  }
  0x8d   : > { %s2609_s26 = sshll.u32 %s2701_s29, 4  ;;  %s2610_s26 = int_to_ptr.vmem [resolvable:$false] %s2609_s26 }
  0x8e   : > { %v2990_v59 = vsub.s32 %v728_v52, %v489_v16  ;;  %s2611_s24 = scalar_lea.vmem %s2610_s26, 256 }
 0x115   : > { %v475_v2 = vpop.xlane.xlu0 %474 }
 0x116   : > { %v477_v3 = vmul.f32 0.03125, %v475_v2 }
 0x118   : > { %v478_v4 = vsub.f32 %v2939_v0, %v477_v3 }
 0x11a   : > { %v479_v5 = vmul.f32 %v478_v4, %v478_v4 }
 0x11c   : > { %v480_v6 = vsel %vm472_vm0, %v479_v5, 0.0 }
 0x11d   : > { %481 = vadd.xlane.f32.xlu0 %v480_v6 }
 0x1a6   : > { %v482_v12 = vpop.xlane.xlu0 %481 }
 0x1a7   : > { %v483_v13 = vmul.f32 0.03125, %v482_v12 }
 0x1a9   : > { %v484_v14 = vadd.f32 1e-05, %v483_v13 }
 0x1ab   : > { %2425 = vrsqrt.f32 %v484_v14 }
 0x1b8   : > { %v2426_v21 = vpop.eup %2425 }
 0x1b9   : > { %v486_v22 = vmul.f32 %v2426_v21, %v478_v4 }
 0x1bb   : > { %v492_v24 = vmul.f32 %v491_v20, %v486_v22 }
 0x1bd   : > { %v497_v25 = vadd.f32 %v2117_v23, %v492_v24 }
 0x1bf   : > { %v498_v27 = vpack.c.bf16 %v497_v25, %v497_v25 }
 0x1c1   : > { %2207 = vmatmul.mubr.msk.bf16.vlgmr.msra.gmra.mxu0 %vm472_vm0, %v498_v27  ;;  %2215 = vmatmul.mubr.msk.bf16.vlgmr.msra.gmra.mxu1 %vm472_vm0, %v498_v27 }
 0x1c2   : > { %2219 = vmatpush3.bf16.msra.mxu0 %v2415_v26  ;;  %2222 = vmatprep.mubr.msk.bf16.mxu0 %vm2692_vm1, %v2691_v9 }
 0x1c3   : > { %2220 = vmatprep.subr.bf16.mxu0 %v2691_v9  ;;  %2228 = vmatprep.mubr.msk.bf16.mxu1 %vm2692_vm1, %v2691_v9 }
 0x1c6   : > { %2221 = vmatpush3.bf16.msra.mxu0 %v2416_v28 }
 0x1c7   : > { %2232 = vmatprep.subr.bf16.mxu0 %v2691_v9 }
 0x1c9   : > { %2223 = vmatmul.mubr.msk.bf16.vlgmr.msra.gmra.mxu0 %vm472_vm0, %v498_v27 }
 0x1ca   : > { %2234 = vmatprep.mubr.msk.bf16.mxu0 %vm2692_vm1, %v2691_v9 }
 0x281   : > { %v556_v30 = vpop.f32.mrf.mxu0  ;;  %v616_v31 = vpop.f32.mrf.mxu1 }
 0x282   : > { %v617_v32 = vadd.f32 %v2122_v29, %v616_v31  ;;  %v557_v41 = vadd.f32 %v2118_v37, %v556_v30 }
 0x283   : > { %v2208_v33 = vpop.f32.mrf.mxu0  ;;  %v2216_v34 = vpop.f32.mrf.mxu1 }
 0x284   : > { %839 = vrot.lane.b32.xlu0 %v617_v32, %s2693_s18  ;;  %833 = vrot.lane.b32.xlu1 %v617_v32, %s2694_s7 }
 0x285   : > { %v559_v35 = vpop.f32.mrf.mxu0  ;;  %v619_v36 = vpop.f32.mrf.mxu1 }
 0x287   : > { %v2209_v38 = vpop.f32.mrf.mxu0  ;;  %v2217_v39 = vpop.f32.mrf.mxu1 }
 0x288   : > { %836 = vrot.lane.b32.xlu1 %v617_v32, %s2695_s4 }
 0x289   : > { %v2983_v40 = vpop.f32.mrf.mxu0 }
 0x28b   : > { %v2224_v42 = vpop.f32.mrf.mxu0 }
 0x28c   : > { %683 = vrot.lane.b32.xlu1 %v557_v41, %s2694_s7 }
 0x28d   : > { %v679_v43 = vpop.f32.mrf.mxu0 }
 0x28f   : > { %v2225_v44 = vpop.f32.mrf.mxu0 }
 0x290   : > { %686 = vrot.lane.b32.xlu1 %v557_v41, %s2695_s4 }
 0x294   : > { %689 = vrot.lane.b32.xlu1 %v557_v41, %s2693_s18 }
 0x2f6   : > { %v840_v50 = vpop.permute.xlu0 %839  ;;  %v834_v51 = vpop.permute.xlu1 %833 }
 0x2f7   : > { %v858_v54 = vcombine.low %v834_v51, %v840_v50  ;;  %v859_v55 = vcombine.high %v834_v51, %v840_v50 }
 0x2f9   : > { %v866_v60 = vrot.slane %v858_v54, %v2988_v53  ;;  %v873_v61 = vrot.slane %v859_v55, %v2988_v53 }
 0x2fa   : > { %v837_v56 = vpop.permute.xlu1 %836 }
 0x2fb   : > { %v842_v57 = vcombine.low %v617_v32, %v837_v56  ;;  %v843_v58 = vcombine.high %v617_v32, %v837_v56 }
 0x2fd   : > { %v850_v62 = vrot.slane %v842_v57, %v2988_v53  ;;  %v857_v63 = vrot.slane %v843_v58, %v2988_v53 }
 0x2fe   : > { %v684_v1 = vpop.permute.xlu1 %683 }
 0x2ff   : > { %v874_v2 = vcombine.low %v850_v62, %v866_v60  ;;  %v875_v3 = vcombine.high %v850_v62, %v866_v60  ;;  %v890_v4 = vcombine.low %v857_v63, %v873_v61  ;;  %v891_v5 = vcombine.high %v857_v63, %v873_v61 }
 0x301   : > { %v882_v6 = vrot.slane %v874_v2, %v2990_v59  ;;  %v889_v7 = vrot.slane %v875_v3, %v2990_v59  ;;  %v898_v8 = vrot.slane %v890_v4, %v2990_v59  ;;  %v905_v10 = vrot.slane %v891_v5, %v2990_v59 }
 0x302   : > { %v687_v11 = vpop.permute.xlu1 %686 }
 0x303   : > { %v910_v12 = vcombine.low %v882_v6, %v889_v7  ;;  %v2132_v13 = vcombine.high %v882_v6, %v889_v7  ;;  %v926_v14 = vcombine.low %v898_v8, %v905_v10  ;;  %v2133_v15 = vcombine.high %v898_v8, %v905_v10 }
 0x304   : > { %v692_v16 = vcombine.low %v557_v41, %v687_v11  ;;  %v693_v17 = vcombine.high %v557_v41, %v687_v11 }
 0x305   : > { %v917_v18 = vrot.slane %v910_v12, %v2988_v53  ;;  %v925_v19 = vrot.slane %v2132_v13, %v2988_v53  ;;  %v933_v20 = vrot.slane %v926_v14, %v2988_v53  ;;  %v941_v21 = vrot.slane %v2133_v15, %v2988_v53 }
 0x306   : > { %v690_v22 = vpop.permute.xlu1 %689  ;;  %v700_v27 = vrot.slane %v692_v16, %v2988_v53  ;;  %v707_v28 = vrot.slane %v693_v17, %v2988_v53 }
 0x307   : > { %v708_v23 = vcombine.low %v684_v1, %v690_v22  ;;  %v709_v24 = vcombine.high %v684_v1, %v690_v22  ;;  %v942_v25 = vcombine.low %v917_v18, %v925_v19  ;;  %v958_v26 = vcombine.low %v933_v20, %v941_v21 }
 0x308   : > { %v943_v33 = vcombine.high %v917_v18, %v925_v19  ;;  %v959_v34 = vcombine.high %v933_v20, %v941_v21 }
 0x309   : > { %v716_v29 = vrot.slane %v708_v23, %v2988_v53  ;;  %v723_v30 = vrot.slane %v709_v24, %v2988_v53  ;;  %v950_v31 = vrot.slane %v942_v25, %v2990_v59  ;;  %v966_v32 = vrot.slane %v958_v26, %v2990_v59 }
 0x30a   : > { %v957_v48 = vrot.slane %v943_v33, %v2990_v59  ;;  %v973_v49 = vrot.slane %v959_v34, %v2990_v59 }
 0x30b   : > { %v724_v35 = vcombine.low %v700_v27, %v716_v29  ;;  %v725_v36 = vcombine.high %v700_v27, %v716_v29  ;;  %v740_v37 = vcombine.low %v707_v28, %v723_v30  ;;  %v741_v38 = vcombine.high %v707_v28, %v723_v30 }
 0x30c   : > { %v974_v39 = vcombine.low %v950_v31, %v966_v32  ;;  %v975_v41 = vcombine.high %v950_v31, %v966_v32  ;;  %v976_v1 = vcombine.low %v957_v48, %v973_v49  ;;  %v977_v2 = vcombine.high %v957_v48, %v973_v49 }
 0x30d   : > { %v732_v42 = vrot.slane %v724_v35, %v2990_v59  ;;  %v739_v43 = vrot.slane %v725_v36, %v2990_v59  ;;  %v748_v44 = vrot.slane %v740_v37, %v2990_v59  ;;  %v755_v45 = vrot.slane %v741_v38, %v2990_v59 }
 0x30e   : > { %v978_v46 = vpack.c.bf16 %v974_v39, %v974_v39  ;;  %v979_v47 = vpack.c.bf16 %v975_v41, %v975_v41  ;;  %v980_v10 = vpack.c.bf16 %v976_v1, %v976_v1  ;;  %v981_v11 = vpack.c.bf16 %v977_v2, %v977_v2 }
 0x30f   : > { %v760_v50 = vcombine.low %v732_v42, %v739_v43  ;;  %v2130_v51 = vcombine.high %v732_v42, %v739_v43  ;;  %v776_v52 = vcombine.low %v748_v44, %v755_v45  ;;  %v2131_v54 = vcombine.high %v748_v44, %v755_v45 }
 0x310   : > { %v1137_v55 = vsel %vm1132_vm2, %v978_v46, 0  ;;  %v1183_v56 = vsel %vm1132_vm2, %v979_v47, 0  ;;  %v1229_v16 = vsel %vm1132_vm2, %v980_v10, 0  ;;  %v1275_v17 = vsel %vm1132_vm2, %v981_v11, 0  ;;  %v2126_v47 = vld [vmem:[#allocation8 + $0x2] ss:$0 sm:$0xff] }
 0x311   : > { %v767_v57 = vrot.slane %v760_v50, %v2988_v53  ;;  %v775_v58 = vrot.slane %v2130_v51, %v2988_v53  ;;  %v783_v60 = vrot.slane %v776_v52, %v2988_v53  ;;  %v791_v61 = vrot.slane %v2131_v54, %v2988_v53  ;;  %2227 = vmatpush3.bf16.xpose.msra.mxu1 %v1137_v55 }
 0x312   : > { %2233 = vmatpush3.bf16.xpose.msra.mxu0 %v1183_v56  ;;  %2238 = vmatprep.subr.bf16.mxu1 %v2691_v9  ;;  %v677_v48 = vadd.f32 %v2126_v47, %v2983_v40 }
 0x313   : > { %v792_v62 = vcombine.low %v767_v57, %v775_v58  ;;  %v808_v63 = vcombine.low %v783_v60, %v791_v61  ;;  %2244 = vmatprep.subr.bf16.mxu0 %v2691_v9  ;;  %v793_v3 = vcombine.high %v767_v57, %v775_v58  ;;  %v809_v4 = vcombine.high %v783_v60, %v791_v61 }
 0x315   : > { %v800_v5 = vrot.slane %v792_v62, %v2990_v59  ;;  %v816_v6 = vrot.slane %v808_v63, %v2990_v59  ;;  %v807_v14 = vrot.slane %v793_v3, %v2990_v59  ;;  %v823_v15 = vrot.slane %v809_v4, %v2990_v59 }
 0x317   : > { %v824_v7 = vcombine.low %v800_v5, %v816_v6  ;;  %v825_v8 = vcombine.high %v800_v5, %v816_v6  ;;  %v826_v18 = vcombine.low %v807_v14, %v823_v15  ;;  %v827_v19 = vcombine.high %v807_v14, %v823_v15 }
 0x319   : > { %v828_v12 = vpack.c.bf16 %v824_v7, %v824_v7  ;;  %v829_v13 = vpack.c.bf16 %v825_v8, %v825_v8  ;;  %v830_v20 = vpack.c.bf16 %v826_v18, %v826_v18  ;;  %v831_v21 = vpack.c.bf16 %v827_v19, %v827_v19 }
 0x31b   : > { %2229 = vmatmul.mubr.msk.bf16.vlgmr.msra.gmra.mxu1 %vm1132_vm2, %v828_v12  ;;  %2235 = vmatmul.mubr.msk.bf16.vlgmr.msra.gmra.mxu0 %vm1132_vm2, %v829_v13 }
 0x31c   : > { %2239 = vmatpush3.bf16.xpose.msra.mxu1 %v1229_v16  ;;  %2245 = vmatpush3.bf16.xpose.msra.mxu0 %v1275_v17 }
 0x31d   : > { %2240 = vmatprep.mubr.msk.bf16.mxu1 %vm2692_vm1, %v2691_v9  ;;  %2246 = vmatprep.mubr.msk.bf16.mxu0 %vm2692_vm1, %v2691_v9 }
 0x31e   : > { %2250 = vmatprep.subr.bf16.mxu1 %v2691_v9  ;;  %2256 = vmatprep.subr.bf16.mxu0 %v2691_v9 }
 0x323   : > { %2241 = vmatmul.mubr.msk.bf16.vlgmr.msra.gmra.mxu1 %vm1132_vm2, %v830_v20  ;;  %2247 = vmatmul.mubr.msk.bf16.vlgmr.msra.gmra.mxu0 %vm1132_vm2, %v831_v21 }
 0x324   : > { %2252 = vmatprep.mubr.msk.bf16.mxu1 %vm2692_vm1, %v2691_v9  ;;  %2258 = vmatprep.mubr.msk.bf16.mxu0 %vm2692_vm1, %v2691_v9 }
 0x3db   : > { %v1173_v22 = vpop.f32.mrf.mxu1  ;;  %v1219_v23 = vpop.f32.mrf.mxu0 }
 0x3dc   : > { %v1317_v24 = vmul.f32 0.35355338, %v1173_v22  ;;  %v1318_v25 = vmul.f32 0.35355338, %v1219_v23 }
 0x3dd   : > { %v2230_v26 = vpop.f32.mrf.mxu1  ;;  %v2236_v27 = vpop.f32.mrf.mxu0 }
 0x3de   : > { %v1321_v28 = vsel %vm1132_vm2, %v1317_v24, -inf  ;;  %v1324_v29 = vsel %vm1132_vm2, %v1318_v25, -inf }
 0x3df   : > { %1322 = vmax.xlane.f32.xlu1 %v1321_v28  ;;  %v1176_v30 = vpop.f32.mrf.mxu1  ;;  %1325 = vmax.xlane.f32.xlu0 %v1324_v29  ;;  %v1222_v31 = vpop.f32.mrf.mxu0 }
 0x3e1   : > { %v2231_v32 = vpop.f32.mrf.mxu1  ;;  %v2237_v33 = vpop.f32.mrf.mxu0 }
 0x3e3   : > { %v1265_v34 = vpop.f32.mrf.mxu1  ;;  %v1311_v35 = vpop.f32.mrf.mxu0 }
 0x3e4   : > { %v1319_v36 = vmul.f32 0.35355338, %v1265_v34  ;;  %v1320_v39 = vmul.f32 0.35355338, %v1311_v35 }
 0x3e5   : > { %v2242_v37 = vpop.f32.mrf.mxu1  ;;  %v2248_v38 = vpop.f32.mrf.mxu0 }
 0x3e6   : > { %v1327_v41 = vsel %vm1132_vm2, %v1319_v36, -inf  ;;  %v1330_v46 = vsel %vm1132_vm2, %v1320_v39, -inf }
 0x3e7   : > { %1328 = vmax.xlane.f32.xlu1 %v1327_v41  ;;  %v1268_v42 = vpop.f32.mrf.mxu1  ;;  %v1314_v43 = vpop.f32.mrf.mxu0 }
 0x3e9   : > { %v2243_v44 = vpop.f32.mrf.mxu1  ;;  %v2249_v45 = vpop.f32.mrf.mxu0 }
 0x3eb   : > { %1331 = vmax.xlane.f32.xlu1 %v1330_v46 }
 0x3fc   : > { %986 = vrot.lane.b32.xlu1 %v677_v48, %s2695_s4 }
 0x468   : > { %v1323_v49 = vpop.xlane.xlu1 %1322  ;;  %v1326_v50 = vpop.xlane.xlu0 %1325 }
 0x469   : > { %v1333_v51 = vsub.f32 %v1317_v24, %v1323_v49  ;;  %v1334_v52 = vsub.f32 %v1318_v25, %v1326_v50 }
 0x46b   : > { %v1337_v54 = vmul.f32 1.442695, %v1333_v51  ;;  %v1339_v55 = vmul.f32 1.442695, %v1334_v52 }
 0x46d   : > { %2427 = vpow2.f32 %v1337_v54 }
 0x46e   : > { %2429 = vpow2.f32 %v1339_v55 }
 0x470   : > { %v1329_v60 = vpop.xlane.xlu1 %1328 }
 0x471   : > { %v1335_v62 = vsub.f32 %v1319_v36, %v1329_v60 }
 0x473   : > { %v1341_v1 = vmul.f32 1.442695, %v1335_v62 }
 0x474   : > { %v1332_v61 = vpop.xlane.xlu1 %1331 }
 0x475   : > { %v1336_v63 = vsub.f32 %v1320_v39, %v1332_v61  ;;  %2431 = vpow2.f32 %v1341_v1 }
 0x477   : > { %v1343_v2 = vmul.f32 1.442695, %v1336_v63 }
 0x478   : > { %v987_v7 = vpop.permute.xlu1 %986 }
 0x479   : > { %2433 = vpow2.f32 %v1343_v2  ;;  %v992_v11 = vcombine.low %v677_v48, %v987_v7  ;;  %v993_v12 = vcombine.high %v677_v48, %v987_v7 }
 0x47a   : > { %v3050_v56 = vpop.eup %2427 }
 0x47b   : > { %v3052_v57 = vpop.eup %2429  ;;  %v1345_v58 = vsel %vm1132_vm2, %v3050_v56, 0.0  ;;  %v1000_v17 = vrot.slane %v992_v11, %v2988_v53  ;;  %v1007_v18 = vrot.slane %v993_v12, %v2988_v53 }
 0x47c   : > { %1346 = vadd.xlane.f32.xlu0 %v1345_v58  ;;  %v1348_v40 = vsel %vm1132_vm2, %v3052_v57, 0.0 }
 0x47d   : > { %1349 = vadd.xlane.f32.xlu1 %v1348_v40 }
 0x482   : > { %v3060_v3 = vpop.eup %2431 }
 0x483   : > { %v1351_v5 = vsel %vm1132_vm2, %v3060_v3, 0.0 }
 0x486   : > { %v3062_v4 = vpop.eup %2433 }
 0x487   : > { %v1354_v6 = vsel %vm1132_vm2, %v3062_v4, 0.0 }
 0x48e   : > { %989 = vrot.lane.b32.xlu1 %v677_v48, %s2693_s18  ;;  %s2163_s18 = sshll.u32 %s2778_s19, 7  ;;  %s1955_s19 = scalar_lea.sflag [#allocation4], %s2912_s5 }
 0x492   : > { %983 = vrot.lane.b32.xlu0 %v677_v48, %s2694_s7  ;;  %s456_s7 = scalar_lea.vmem [#allocation13], %s2115_s6 }
 0x493   : > { %s1968_s4 = sshll.u32 %s456_s7, 4  ;;  %s3162_s4 = int_to_ptr.vmem [resolvable:$true] %s1968_s4 }
 0x494   : > { %s2605_s22 = scalar_lea.vmem %s3162_s4, 128  ;;  %p2612_p8 = scmp.lt.s32.totalorder %s3162_s4, %s2610_s26 }
 0x495   : > { %p2606_p11 = scmp.ne.s32.totalorder %s3162_s4, %s2605_s22  ;;  %p2613_p10 = scmp.lt.s32.totalorder %s2611_s24, %s2605_s22 }
 0x497   : > { %p2607_p0 = pnand %p2606_p11, %p3244_p13  ;;  %p2614_p1 = por %p2613_p10, %p2612_p8 }
 0x499   : > { %p2608_p5 = pneg %p2607_p0 }
 0x49b   : > { %p2615_p3 = pnand %p2614_p1, %p2608_p5 }
 0x4b1   : > { %1352 = vadd.xlane.f32.xlu0 %v1351_v5 }
 0x4b2   : > { %1355 = vadd.xlane.f32.xlu1 %v1354_v6 }
 0x505   : > { %v1347_v8 = vpop.xlane.xlu0 %1346 }
 0x506   : > { %v1350_v10 = vpop.xlane.xlu1 %1349  ;;  %2435 = vrcp.f32 %v1347_v8 }
 0x507   : > { %2437 = vrcp.f32 %v1350_v10 }
 0x509   : > { %v984_v13 = vpop.permute.xlu0 %983 }
 0x50a   : > { %v990_v14 = vpop.permute.xlu1 %989 }
 0x50b   : > { %v1008_v15 = vcombine.low %v984_v13, %v990_v14  ;;  %v1009_v16 = vcombine.high %v984_v13, %v990_v14  ;;  %v2417_v13 = vld [vmem:[#allocation7 + $0x8] sm:$0xff]  }
 0x50d   : > { %v1016_v19 = vrot.slane %v1008_v15, %v2988_v53  ;;  %v1023_v20 = vrot.slane %v1009_v16, %v2988_v53 }
 0x50f   : > { %v1024_v21 = vcombine.low %v1000_v17, %v1016_v19  ;;  %v1025_v22 = vcombine.high %v1000_v17, %v1016_v19  ;;  %v1040_v23 = vcombine.low %v1007_v18, %v1023_v20  ;;  %v1041_v24 = vcombine.high %v1007_v18, %v1023_v20 }
 0x511   : > { %v1032_v25 = vrot.slane %v1024_v21, %v2990_v59  ;;  %v1039_v26 = vrot.slane %v1025_v22, %v2990_v59  ;;  %v1048_v27 = vrot.slane %v1040_v23, %v2990_v59  ;;  %v1055_v28 = vrot.slane %v1041_v24, %v2990_v59 }
 0x513   : > { %v1060_v29 = vcombine.low %v1032_v25, %v1039_v26  ;;  %v2134_v30 = vcombine.high %v1032_v25, %v1039_v26  ;;  %v1076_v31 = vcombine.low %v1048_v27, %v1055_v28  ;;  %v2135_v32 = vcombine.high %v1048_v27, %v1055_v28  ;;  %v2436_v42 = vpop.eup %2435 }
 0x514   : > { %v2438_v47 = vpop.eup %2437  ;;  %v1361_v55 = vmul.f32 %v2436_v42, %v3050_v56 }
 0x515   : > { %v1067_v33 = vrot.slane %v1060_v29, %v2988_v53  ;;  %v1075_v34 = vrot.slane %v2134_v30, %v2988_v53  ;;  %v1083_v35 = vrot.slane %v1076_v31, %v2988_v53  ;;  %v1091_v36 = vrot.slane %v2135_v32, %v2988_v53 }
 0x516   : > { %v1362_v58 = vmul.f32 %v2438_v47, %v3052_v57  ;;  %v1365_v63 = vpack.c.bf16 %v1361_v55, %v1361_v55 }
 0x517   : > { %v1092_v37 = vcombine.low %v1067_v33, %v1075_v34  ;;  %v1108_v38 = vcombine.low %v1083_v35, %v1091_v36  ;;  %v1093_v39 = vcombine.high %v1067_v33, %v1075_v34  ;;  %v1109_v41 = vcombine.high %v1083_v35, %v1091_v36 }
 0x518   : > { %v1366_v1 = vpack.c.bf16 %v1362_v58, %v1362_v58 }
 0x519   : > { %v1100_v43 = vrot.slane %v1092_v37, %v2990_v59  ;;  %v1116_v44 = vrot.slane %v1108_v38, %v2990_v59  ;;  %v1107_v45 = vrot.slane %v1093_v39, %v2990_v59  ;;  %v1123_v46 = vrot.slane %v1109_v41, %v2990_v59  ;;  %v2418_v41 = vld [vmem:[#allocation7] sm:$0xff]  }
 0x51b   : > { %v1124_v48 = vcombine.low %v1100_v43, %v1116_v44  ;;  %v1125_v49 = vcombine.high %v1100_v43, %v1116_v44  ;;  %v1126_v50 = vcombine.low %v1107_v45, %v1123_v46  ;;  %v1127_v51 = vcombine.high %v1107_v45, %v1123_v46 }
 0x51d   : > { %v1128_v52 = vpack.c.bf16 %v1124_v48, %v1124_v48  ;;  %v1129_v54 = vpack.c.bf16 %v1125_v49, %v1125_v49  ;;  %v1130_v61 = vpack.c.bf16 %v1126_v50, %v1126_v50  ;;  %v1131_v62 = vpack.c.bf16 %v1127_v51, %v1127_v51 }
 0x51f   : > { %v1374_v40 = vsel %vm1372_vm3, %v1128_v52, 0  ;;  %v1420_v60 = vsel %vm1372_vm3, %v1129_v54, 0  ;;  %v1466_v56 = vsel %vm1372_vm3, %v1130_v61, 0  ;;  %v1512_v57 = vsel %vm1372_vm3, %v1131_v62, 0 }
 0x520   : > { %2251 = vmatpush3.bf16.msra.mxu1 %v1374_v40  ;;  %2257 = vmatpush3.bf16.msra.mxu0 %v1420_v60 }
 0x521   : > { %2262 = vmatprep.subr.bf16.mxu1 %v2691_v9  ;;  %2268 = vmatprep.subr.bf16.mxu0 %v2691_v9 }
 0x523   : > { %2253 = vmatmul.mubr.msk.bf16.vlgmr.msra.gmra.mxu1 %vm1132_vm2, %v1365_v63  ;;  %2259 = vmatmul.mubr.msk.bf16.vlgmr.msra.gmra.mxu0 %vm1132_vm2, %v1366_v1 }
 0x524   : > { %2263 = vmatpush3.bf16.msra.mxu1 %v1466_v56  ;;  %2269 = vmatpush3.bf16.msra.mxu0 %v1512_v57 }
 0x525   : > { %2264 = vmatprep.mubr.msk.bf16.mxu1 %vm2692_vm1, %v2691_v9  ;;  %2270 = vmatprep.mubr.msk.bf16.mxu0 %vm2692_vm1, %v2691_v9 }
 0x526   : > { %2274 = vmatprep.subr.bf16.mxu1 %v2691_v9  ;;  %2282 = vmatprep.subr.bf16.mxu0 %v2691_v9 }
 0x53a   : > { %v1353_v2 = vpop.xlane.xlu0 %1352 }
 0x53b   : > { %2439 = vrcp.f32 %v1353_v2  ;;  %v1356_v5 = vpop.xlane.xlu1 %1355 }
 0x53c   : > { %2441 = vrcp.f32 %v1356_v5 }
 0x548   : > { %v2440_v6 = vpop.eup %2439 }
 0x549   : > { %v2442_v7 = vpop.eup %2441  ;;  %v1363_v8 = vmul.f32 %v2440_v6, %v3060_v3 }
 0x54a   : > { %v1364_v10 = vmul.f32 %v2442_v7, %v3062_v4 }
 0x54b   : > { %v1367_v11 = vpack.c.bf16 %v1363_v8, %v1363_v8 }
 0x54c   : > { %v1368_v12 = vpack.c.bf16 %v1364_v10, %v1364_v10 }
 0x54d   : > { %2265 = vmatmul.mubr.msk.bf16.vlgmr.msra.gmra.mxu1 %vm1132_vm2, %v1367_v11 }
 0x54e   : > { %2271 = vmatmul.mubr.msk.bf16.vlgmr.msra.gmra.mxu0 %vm1132_vm2, %v1368_v12  ;;  %2278 = vmatprep.mubr.msk.bf16.mxu1 %vm2692_vm1, %v2691_v9  ;;  %v2146_v12 = vld [vmem:[#allocation8 + $0x3] ss:$0 sm:$0xff] }
 0x54f   : > { %2286 = vmatprep.mubr.msk.bf16.mxu0 %vm2692_vm1, %v2691_v9  ;;  %2275 = vmatpush3.bf16.msra.mxu1 %v2417_v13 }
 0x550   : > { %2276 = vmatprep.subr.bf16.mxu1 %v2691_v9 }
 0x553   : > { %2277 = vmatpush3.bf16.msra.mxu1 %v2418_v41 }
 0x554   : > { %2290 = vmatprep.subr.bf16.mxu1 %v2691_v9 }
 0x5e3   : > { %v1410_v14 = vpop.f32.mrf.mxu1  ;;  %v1456_v3 = vpop.f32.mrf.mxu0 }
 0x5e5   : > { %v2254_v15 = vpop.f32.mrf.mxu1  ;;  %v2260_v4 = vpop.f32.mrf.mxu0 }
 0x5e7   : > { %v1413_v16 = vpop.f32.mrf.mxu1  ;;  %v1459_v17 = vpop.f32.mrf.mxu0 }
 0x5e9   : > { %v2255_v18 = vpop.f32.mrf.mxu1  ;;  %v2261_v19 = vpop.f32.mrf.mxu0 }
 0x60d   : > { %v1502_v20 = vpop.f32.mrf.mxu1 }
 0x60e   : > { %v1554_v21 = vcombine.low %v1410_v14, %v1502_v20  ;;  %v1555_v22 = vcombine.high %v1410_v14, %v1502_v20  ;;  %v1548_v23 = vpop.f32.mrf.mxu0 }
 0x60f   : > { %v1570_v24 = vcombine.low %v1456_v3, %v1548_v23  ;;  %v1571_v25 = vcombine.high %v1456_v3, %v1548_v23  ;;  %v2266_v26 = vpop.f32.mrf.mxu1  ;;  %v2419_v23 = vld [vmem:[#allocation10 + $0x8] sm:$0xff]  }
 0x610   : > { %v1562_v27 = vrot.slane %v1554_v21, %v2988_v53  ;;  %v1569_v28 = vrot.slane %v1555_v22, %v2988_v53  ;;  %v2272_v29 = vpop.f32.mrf.mxu0  ;;  %2283 = vmatpush3.bf16.msra.mxu0 %v2419_v23 }
 0x611   : > { %v1578_v30 = vrot.slane %v1570_v24, %v2988_v53  ;;  %v1585_v31 = vrot.slane %v1571_v25, %v2988_v53  ;;  %v1505_v32 = vpop.f32.mrf.mxu1  ;;  %v2420_v24 = vld [vmem:[#allocation10] sm:$0xff]   ;;  %2284 = vmatprep.subr.bf16.mxu0 %v2691_v9 }
 0x612   : > { %v1551_v33 = vpop.f32.mrf.mxu0 }
 0x613   : > { %v1586_v34 = vcombine.low %v1562_v27, %v1578_v30  ;;  %v1587_v35 = vcombine.high %v1562_v27, %v1578_v30  ;;  %v1602_v36 = vcombine.low %v1569_v28, %v1585_v31  ;;  %v1603_v37 = vcombine.high %v1569_v28, %v1585_v31  ;;  %v2267_v38 = vpop.f32.mrf.mxu1  ;;  %v2150_v28 = vld [vmem:[#allocation8 + $0x4] ss:$0 sm:$0xff]  ;;  %v2151_v30 = vld [vmem:[#allocation8 + $0x5] ss:$0 sm:$0xff] }
 0x614   : > { %v2273_v39 = vpop.f32.mrf.mxu0  ;;  %2285 = vmatpush3.bf16.msra.mxu0 %v2420_v24  ;;  %v2152_v38 = vld [vmem:[#allocation11] ss:$0 sm:$0xff] }
 0x615   : > { %v1594_v42 = vrot.slane %v1586_v34, %v2990_v59  ;;  %v1601_v43 = vrot.slane %v1587_v35, %v2990_v59  ;;  %v1610_v44 = vrot.slane %v1602_v36, %v2990_v59  ;;  %v1617_v45 = vrot.slane %v1603_v37, %v2990_v59  ;;  %v2421_v34 = vld [vmem:[%s3213_s9 + $0x18] sm:$0xff]   ;;  %v2422_v35 = vld [vmem:[%s3213_s9 + $0x10] sm:$0xff]   ;;  %v2423_v36 = vld [vmem:[%s3213_s9 + $0x8] sm:$0xff]  }
 0x616   : > { %v2424_v37 = vld [vmem:[%s3213_s9] sm:$0xff]  }
 0x617   : > { %v1622_v46 = vcombine.low %v1594_v42, %v1601_v43  ;;  %v2144_v47 = vcombine.high %v1594_v42, %v1601_v43  ;;  %v1638_v48 = vcombine.low %v1610_v44, %v1617_v45  ;;  %v2145_v49 = vcombine.high %v1610_v44, %v1617_v45 }
 0x619   : > { %v1629_v50 = vrot.slane %v1622_v46, %v2988_v53  ;;  %v1637_v51 = vrot.slane %v2144_v47, %v2988_v53  ;;  %v1645_v52 = vrot.slane %v1638_v48, %v2988_v53  ;;  %v1653_v54 = vrot.slane %v2145_v49, %v2988_v53 }
 0x61b   : > { %v1655_v55 = vcombine.high %v1629_v50, %v1637_v51  ;;  %v1671_v58 = vcombine.high %v1645_v52, %v1653_v54  ;;  %v1654_v40 = vcombine.low %v1629_v50, %v1637_v51  ;;  %v1670_v60 = vcombine.low %v1645_v52, %v1653_v54 }
 0x61d   : > { %v1669_v61 = vrot.slane %v1655_v55, %v2990_v59  ;;  %v1685_v62 = vrot.slane %v1671_v58, %v2990_v59  ;;  %v1662_v63 = vrot.slane %v1654_v40, %v2990_v59  ;;  %v1678_v1 = vrot.slane %v1670_v60, %v2990_v59  ;;  %v2156_v55 = vld [vmem:[#allocation8 + $0x6] ss:$0 sm:$0xff] }
 0x61f   : > { %v1688_v56 = vcombine.low %v1669_v61, %v1685_v62  ;;  %v1687_v57 = vcombine.high %v1662_v63, %v1678_v1  ;;  %v1686_v2 = vcombine.low %v1662_v63, %v1678_v1  ;;  %v1689_v53 = vcombine.high %v1669_v61, %v1685_v62 }
 0x621   : > { %1695 = vrot.lane.b32.xlu1 %v1688_v56, %s2698_s8  ;;  %1691 = vrot.lane.b32.xlu0 %v1687_v57, %s2699_s20 }
 0x625   : > { %1699 = vrot.lane.b32.xlu0 %v1689_v53, %s2700_s11  ;;  %s3160_s11 = scalar_lea.hbm %s3214_s10, %s2163_s18 }
 0x693   : > { %v1692_v5 = vpop.permute.xlu0 %1691  ;;  %v1696_v6 = vpop.permute.xlu1 %1695 }
 0x694   : > { %v1702_v7 = vsel %vm1132_vm2, %v1686_v2, %v1692_v5 }
 0x695   : > { %v1704_v10 = vsel %vm1703_vm4, %v1702_v7, %v1696_v6 }
 0x697   : > { %v1700_v8 = vpop.permute.xlu0 %1699 }
 0x698   : > { %v1706_v11 = vsel %vm1705_vm5, %v1704_v10, %v1700_v8 }
 0x699   : > { %v1707_v59 = vpack.c.bf16 %v1706_v11, %v1706_v11 }
 0x69b   : > { %2279 = vmatmul.mubr.msk.bf16.vlgmr.msra.gmra.mxu1 %vm472_vm0, %v1707_v59 }
 0x69c   : > { %2298 = vmatprep.mubr.msk.bf16.mxu1 %vm2692_vm1, %v2691_v9  ;;  %2291 = vmatpush3.bf16.msra.mxu1 %v2421_v34 }
 0x69d   : > { %2292 = vmatprep.subr.bf16.mxu1 %v2691_v9 }
 0x6a0   : > { %2293 = vmatpush3.bf16.msra.mxu1 %v2422_v35 }
 0x6a1   : > { %2294 = vmatprep.subr.bf16.mxu1 %v2691_v9 }
 0x6a4   : > { %2295 = vmatpush3.bf16.msra.mxu1 %v2423_v36 }
 0x6a5   : > { %2296 = vmatprep.subr.bf16.mxu1 %v2691_v9 }
 0x6a8   : > { %2297 = vmatpush3.bf16.msra.mxu1 %v2424_v37 }
 0x75b   : > { %v1765_v13 = vpop.f32.mrf.mxu1 }
 0x75c   : > { %v1766_v14 = vadd.f32 %v2146_v12, %v1765_v13 }
 0x75d   : > { %v2280_v3 = vpop.f32.mrf.mxu1 }
 0x75e   : > { %v3131_v15 = vadd.f32 %v1766_v14, %v2939_v0 }
 0x75f   : > { %v1768_v4 = vpop.f32.mrf.mxu1 }
 0x760   : > { %v1772_v16 = vsel %vm472_vm0, %v3131_v15, 0.0 }
 0x761   : > { %1773 = vadd.xlane.f32.xlu1 %v1772_v16  ;;  %v2281_v17 = vpop.f32.mrf.mxu1 }
 0x7ea   : > { %v1774_v18 = vpop.xlane.xlu1 %1773 }
 0x7eb   : > { %v1775_v19 = vmul.f32 0.03125, %v1774_v18 }
 0x7ed   : > { %v1776_v20 = vsub.f32 %v3131_v15, %v1775_v19 }
 0x7ef   : > { %v1777_v21 = vmul.f32 %v1776_v20, %v1776_v20 }
 0x7f1   : > { %v1778_v22 = vsel %vm472_vm0, %v1777_v21, 0.0 }
 0x7f2   : > { %1779 = vadd.xlane.f32.xlu0 %v1778_v22 }
 0x87b   : > { %v1780_v0 = vpop.xlane.xlu0 %1779 }
 0x87c   : > { %v1781_v25 = vmul.f32 0.03125, %v1780_v0 }
 0x87e   : > { %v1782_v26 = vadd.f32 1e-05, %v1781_v25 }
 0x880   : > { %2443 = vrsqrt.f32 %v1782_v26 }
 0x88d   : > { %v2444_v27 = vpop.eup %2443 }
 0x88e   : > { %v1784_v29 = vmul.f32 %v2444_v27, %v1776_v20 }
 0x890   : > { %v1789_v31 = vmul.f32 %v2150_v28, %v1784_v29 }
 0x892   : > { %v1794_v32 = vadd.f32 %v2151_v30, %v1789_v31 }
 0x894   : > { %v1795_v33 = vpack.c.bf16 %v1794_v32, %v1794_v32 }
 0x896   : > { %2287 = vmatmul.mubr.msk.bf16.vlgmr.msra.gmra.mxu0 %vm472_vm0, %v1795_v33 }
 0x956   : > { %v1856_v39 = vpop.f32.mrf.mxu0 }
 0x957   : > { %v1857_v41 = vadd.f32 %v2152_v38, %v1856_v39 }
 0x958   : > { %v2288_v42 = vpop.f32.mrf.mxu0 }
 0x959   : > { %v1863_v43 = vmul.f32 0.044715, %v1857_v41  ;;  %v1862_v51 = vmul.f32 0.5, %v1857_v41 }
 0x95a   : > { %v1859_v44 = vpop.f32.mrf.mxu0 }
 0x95b   : > { %v1864_v45 = vmul.f32 %v1863_v43, %v1857_v41 }
 0x95c   : > { %v2289_v46 = vpop.f32.mrf.mxu0 }
 0x95d   : > { %v1865_v47 = vmul.f32 %v1864_v45, %v1857_v41 }
 0x95f   : > { %v1866_v48 = vadd.f32 %v1865_v47, %v1857_v41 }
 0x961   : > { %v1867_v49 = vmul.f32 0.7978846, %v1866_v48 }
 0x963   : > { %2445 = vtanh.f32 %v1867_v49 }
 0x970   : > { %v2446_v50 = vpop.eup %2445 }
 0x971   : > { %v1869_v52 = vadd.f32 1.0, %v2446_v50 }
 0x973   : > { %v1870_v54 = vmul.f32 %v1869_v52, %v1862_v51 }
 0x975   : > { %v1871_v9 = vpack.c.bf16 %v1870_v54, %v1870_v54 }
 0x977   : > { %2299 = vmatmul.mubr.msk.bf16.vlgmr.msra.gmra.mxu1 %vm1908_vm6, %v1871_v9 }
 0xa37   : > { %v1946_v58 = vpop.f32.mrf.mxu1 }
 0xa38   : > { %v1947_v40 = vadd.f32 %v2156_v55, %v1946_v58 }
 0xa39   : > { %v2300_v60 = vpop.f32.mrf.mxu1 }
 0xa3a   : > { %v1952_v61 = vadd.f32 %v1947_v40, %v3131_v15 }
 0xa3b   : > { %v1949_v62 = vpop.f32.mrf.mxu1 }
 0xa3c   : > { %1953 = vst.msk [vmem:[%s456_s7] sm:$0xff] %vm472_vm0, %v1952_v61 }
 0xa3d   : > { %v2301_v63 = vpop.f32.mrf.mxu1 }
 0xa3e   : > { %2618 = shalt.err (!%p2615_p3)
}
 0xa3f   : > { %s2619_s27 = scalar_lea.hbm %s3160_s11, 128  ;;  %s2623_s28 = scalar_lea.hbm %s3214_s10, 256 }
 0xa40   : > { %p2620_p4 = scmp.ne.s32.totalorder %s3160_s11, %s2619_s27  ;;  %p2624_p2 = scmp.lt.s32.totalorder %s3160_s11, %s3214_s10 }
 0xa41   : > { %p2625_p7 = scmp.lt.s32.totalorder %s2623_s28, %s2619_s27 }
 0xa42   : > { %p2621_p12 = pnand %p2620_p4, %p3244_p13 }
 0xa43   : > { %p2626_p9 = por %p2625_p7, %p2624_p2 }
 0xa44   : > { %p2622_p6 = pneg %p2621_p12 }
 0xa46   : > { %p2627_p11 = pnand %p2626_p9, %p2622_p6 }
 0xa48   : > { %2630 = shalt.err (!%p2627_p11)
}
 0xa49   : > { %2324 = dma.vmem_to_hbm [thread:$0]  (%p3244_p13), %s3162_s4, 128, %s3160_s11, %s1955_s19  }
 0xa4a PF: > { %s1980_s18 = sand.u32 1, %s2669_s13   ;;  %p3245_p0 = scmp.ne.s32.totalorder %s3234_s25, 0 }
 0xa4b   : > { %p3246_p5 = scmp.ge.s32.totalorder %s2681_s16, 2  ;;  %s1981_s7 = scalar_lea.sflag [#allocation4], %s1980_s18 }
 0xa4d   : > { %p2347_p8 = pnand %p3246_p5, %p3245_p0 }
 0xa4f   : > { %p2348_p10 = pneg %p2347_p8 }
 0xa51   : > { %2664 = dma.done.wait (%p2348_p10), %s1981_s7, 128  }
 0xa52   : > { %2666 = vsyncadd (%p2348_p10), %s1981_s7, 4294967168  ;;  %p26_p1 = scmp.ge.s32.totalorder %s2855_s23, 4   ;;  %s3247_s13 = smov %s2673_s14 }
 0xa53   : > { %s3248_s14 = smov %s2677_s15  ;;  %s3249_s15 = smov %s2867_s30 }
 0xa54   : > { %s3250_s16 = smov %s2855_s23  ;;  %28 = sbr.rel (!%p26_p1) target bundleno = 14 (0xe), region = 128 }
 0xa59   :  { %1986 = vsyncpa [#allocation3], 1 }
 0xa5a   :  { %1988 = vsyncpa [#allocation3 + $0x1], 1 }
 0xa5b   :  { %1989 = vsyncpa [#allocation6], 1 }
 0xa5c   :  { %1990 = vsyncpa [#allocation9], 1 }
 0xa5d   :  { %1991 = vsyncpa [#allocation12], 1 }
 0xa5e   :  { %1992 = vsyncpa [#allocation4], 1 }
 0xa5f   :  { %1994 = vsyncpa [#allocation4 + $0x1], 1 }

</bundles_post_ra>
